<compile_context>
chip_gen: v6e
topology: v6e:2x2x1
jax: 0.10.0
libtpu: 0.0.40
codegen_flags: <defaults>
</compile_context>

<pallas_src>
import functools
import math

import jax
import jax.numpy as jnp
from jax.experimental import pallas as pl
from jax.experimental.pallas import tpu as pltpu


# ----------------------------------------------------------------------------
# Generation-aware budgets
# ----------------------------------------------------------------------------
_MIB = 1024 * 1024


def _vmem_capacity_bytes():
    try:
        cap = getattr(pltpu.get_tpu_info(), "vmem_capacity_bytes", None)
        if cap:
            return int(cap)
    except Exception:
        pass
    return 64 * _MIB  # conservative default (v7x per-TensorCore VMEM)


_VMEM_CAP = _vmem_capacity_bytes()
# ~25% headroom for Mosaic internal scratch and double-buffered blocks.
_VMEM_LIMIT_BYTES = min((_VMEM_CAP * 3) // 4, 112 * _MIB)
# Bigger FFN row tiles on 128 MiB parts (v5e/v6e); tighter on v7x (64 MiB).
_FFN_ROW_TILE_TARGET = 1024 if _VMEM_CAP >= 100 * _MIB else 512
# Budget for the per-group (hb, S, S) f32 attention-score tensor.
_SCORES_BUDGET_BYTES = 6 * _MIB


# ----------------------------------------------------------------------------
# Shared helpers
# ----------------------------------------------------------------------------
def _ln(x, gamma, beta, eps):
    """LayerNorm over last axis in f32 (biased variance, like torch.nn.LayerNorm)."""
    mu = jnp.mean(x, axis=-1, keepdims=True)
    var = jnp.mean((x - mu) * (x - mu), axis=-1, keepdims=True)
    return (x - mu) * jax.lax.rsqrt(var + eps) * gamma + beta


def _round_up(x, m):
    return ((x + m - 1) // m) * m


def _pick_head_block(num_heads, seq_len):
    """Largest divisor of num_heads whose (hb, S, S) f32 scores fit the budget."""
    per_head = seq_len * seq_len * 4
    hb = max(1, min(num_heads, _SCORES_BUDGET_BYTES // max(per_head, 1)))
    while num_heads % hb:
        hb -= 1
    return hb


# ----------------------------------------------------------------------------
# Kernels
# ----------------------------------------------------------------------------
def attention_block_kernel(
    x_ref,
    pre_g_ref, pre_b_ref,            # embedding LayerNorm (only layer 0)
    ln1g_ref, ln1b_ref,
    wqkv_ref, bqkv_ref,
    wo_ref, bo_ref,
    o_ref,
    *, num_heads, head_block, apply_pre_ln, pre_eps, ln_eps,
):
    x = x_ref[...].astype(jnp.float32)                 # (S, H) f32 working copy

    if apply_pre_ln:                                    # fused embedding LayerNorm
        x = _ln(x, pre_g_ref[0], pre_b_ref[0], pre_eps)

    S, H = x.shape
    hd = H // num_heads

    # ---- LayerNorm 1 (f32) -> bf16 MXU operand ----
    h1 = _ln(x, ln1g_ref[0], ln1b_ref[0], ln_eps).astype(jnp.bfloat16)

    # ---- fused lane-dense QKV projection: one (S,H)@(H,3H) matmul ----
    # 1/sqrt(head_dim) is pre-folded into the Q slice of wqkv/bqkv.
    qkv = jnp.dot(h1, wqkv_ref[...],
                  preferred_element_type=jnp.float32) + bqkv_ref[0]   # (S, 3H) f32

    # Split to heads: (S, 3*nh, hd) -> (3*nh, S, hd); static slices per group.
    qkv = jnp.transpose(qkv.reshape(S, 3 * num_heads, hd), (1, 0, 2))
    q_all = qkv[:num_heads]
    k_all = qkv[num_heads:2 * num_heads]
    v_all = qkv[2 * num_heads:]

    wo = wo_ref[...]                                    # (H, H) bf16
    attn = jnp.zeros((S, H), jnp.float32)
    ghd = head_block * hd
    for g in range(num_heads // head_block):            # static unroll over groups
        lo, hi = g * head_block, (g + 1) * head_block
        qg = q_all[lo:hi].astype(jnp.bfloat16)          # (hb, S, hd)
        kg = k_all[lo:hi].astype(jnp.bfloat16)
        vg = v_all[lo:hi].astype(jnp.bfloat16)

        s = jnp.einsum("hqd,hkd->hqk", qg, kg,
                       preferred_element_type=jnp.float32)            # (hb, S, S) f32
        s_max = jnp.max(s, axis=-1, keepdims=True)
        p = jnp.exp(s - s_max)
        p = p * pl.reciprocal(jnp.sum(p, axis=-1, keepdims=True), approx=True)
        ctx = jnp.einsum("hqk,hkd->hqd", p.astype(jnp.bfloat16), vg,
                         preferred_element_type=jnp.float32)          # (hb, S, hd)

        # Accumulated output projection: lane-dense (S, ghd) @ (ghd, H).
        ctx2d = jnp.transpose(ctx, (1, 0, 2)).reshape(S, ghd).astype(jnp.bfloat16)
        attn = attn + jnp.dot(ctx2d, wo[g * ghd:(g + 1) * ghd, :],
                              preferred_element_type=jnp.float32)

    attn = attn + bo_ref[0]
    o_ref[...] = (x + attn).astype(o_ref.dtype)         # residual 1, bf16 store


def ffn_block_kernel(x_ref, ln2g_ref, ln2b_ref, w1_ref, b1_ref, w2_ref, b2_ref,
                     o_ref, *, ln_eps):
    x = x_ref[...].astype(jnp.float32)                  # (Mt, H) f32

    h2 = _ln(x, ln2g_ref[0], ln2b_ref[0], ln_eps)
    ff = jnp.dot(h2.astype(jnp.bfloat16), w1_ref[...],
                 preferred_element_type=jnp.float32) + b1_ref[0]
    # exact (erf-based) GELU in f32, matching torch.nn.GELU() default
    ff = 0.5 * ff * (1.0 + jax.lax.erf(ff * (1.0 / math.sqrt(2.0))))
    ff = jnp.dot(ff.astype(jnp.bfloat16), w2_ref[...],
                 preferred_element_type=jnp.float32) + b2_ref[0]

    o_ref[...] = (x + ff).astype(o_ref.dtype)           # residual 2


def rows_layernorm_kernel(x_ref, g_ref, b_ref, o_ref, *, eps):
    # Only used when num_hidden_layers == 0 (otherwise the embedding LN is
    # fused into the first attention-block kernel).
    o_ref[...] = _ln(x_ref[...].astype(jnp.float32),
                     g_ref[0], b_ref[0], eps).astype(o_ref.dtype)


# ----------------------------------------------------------------------------
# Wrappers
# ----------------------------------------------------------------------------
def pallas_attention_block(x, lp, emb_ln, *, num_heads, ln_eps, pre_eps):
    B, S, H = x.shape
    head_block = _pick_head_block(num_heads, S)

    apply_pre = emb_ln is not None
    pre_g = emb_ln[0] if apply_pre else jnp.ones((1, H), jnp.float32)
    pre_b = emb_ln[1] if apply_pre else jnp.zeros((1, H), jnp.float32)

    vec_spec = pl.BlockSpec((1, H), lambda b: (0, 0))
    in_specs = [
        pl.BlockSpec((None, S, H), lambda b: (b, 0, 0)),   # x -> kernel sees (S, H)
        vec_spec, vec_spec,                                # embedding LN gamma / beta
        vec_spec, vec_spec,                                # ln1 gamma / beta
        pl.BlockSpec((H, 3 * H), lambda b: (0, 0)),        # Wqkv (bf16, Q pre-scaled)
        pl.BlockSpec((1, 3 * H), lambda b: (0, 0)),        # bqkv
        pl.BlockSpec((H, H), lambda b: (0, 0)),            # Wo (bf16)
        vec_spec,                                          # bo
    ]

    # TODO(synk): when B == 1 on dual-TensorCore parts (v7x), pull a query-block
    # axis into the grid so both TensorCores get work.
    return pl.pallas_call(
        functools.partial(
            attention_block_kernel,
            num_heads=num_heads, head_block=head_block,
            apply_pre_ln=apply_pre, pre_eps=pre_eps, ln_eps=ln_eps,
        ),
        out_shape=jax.ShapeDtypeStruct((B, S, H), jnp.bfloat16),
        grid_spec=pltpu.PrefetchScalarGridSpec(
            num_scalar_prefetch=0,
            grid=(B,),
            in_specs=in_specs,
            out_specs=pl.BlockSpec((None, S, H), lambda b: (b, 0, 0)),
        ),
        compiler_params=pltpu.CompilerParams(
            dimension_semantics=("parallel",),
            vmem_limit_bytes=_VMEM_LIMIT_BYTES,
        ),
    )(
        x, pre_g, pre_b,
        lp["ln1_g"], lp["ln1_b"],
        lp["wqkv"], lp["bqkv"], lp["wo"], lp["bo"],
    )


def pallas_ffn_block(x2, lp, *, ln_eps, out_dtype):
    M, H = x2.shape
    I = lp["w1"].shape[1]

    Mt = min(_FFN_ROW_TILE_TARGET, _round_up(M, 8))
    Mp = _round_up(M, Mt)
    if Mp != M:                                          # padded tail, sliced off below
        x2 = jnp.pad(x2, ((0, Mp - M), (0, 0)))

    in_specs = [
        pl.BlockSpec((Mt, H), lambda i: (i, 0)),         # activation rows
        pl.BlockSpec((1, H), lambda i: (0, 0)),          # ln2 gamma
        pl.BlockSpec((1, H), lambda i: (0, 0)),          # ln2 beta
        pl.BlockSpec((H, I), lambda i: (0, 0)),          # W1 (bf16)
        pl.BlockSpec((1, I), lambda i: (0, 0)),          # b1
        pl.BlockSpec((I, H), lambda i: (0, 0)),          # W2 (bf16)
        pl.BlockSpec((1, H), lambda i: (0, 0)),          # b2
    ]

    out = pl.pallas_call(
        functools.partial(ffn_block_kernel, ln_eps=ln_eps),
        out_shape=jax.ShapeDtypeStruct((Mp, H), out_dtype),
        grid_spec=pltpu.PrefetchScalarGridSpec(
            num_scalar_prefetch=0,
            grid=(Mp // Mt,),
            in_specs=in_specs,
            out_specs=pl.BlockSpec((Mt, H), lambda i: (i, 0)),
        ),
        compiler_params=pltpu.CompilerParams(
            dimension_semantics=("parallel",),
            vmem_limit_bytes=_VMEM_LIMIT_BYTES,
        ),
    )(x2, lp["ln2_g"], lp["ln2_b"], lp["w1"], lp["b1"], lp["w2"], lp["b2"])
    return out[:M] if Mp != M else out


def pallas_rows_layernorm(x2, gamma, beta, *, eps):
    M, H = x2.shape
    Mt = min(_FFN_ROW_TILE_TARGET, _round_up(M, 8))
    Mp = _round_up(M, Mt)
    if Mp != M:
        x2 = jnp.pad(x2, ((0, Mp - M), (0, 0)))
    out = pl.pallas_call(
        functools.partial(rows_layernorm_kernel, eps=eps),
        out_shape=jax.ShapeDtypeStruct((Mp, H), jnp.float32),
        grid_spec=pltpu.PrefetchScalarGridSpec(
            num_scalar_prefetch=0,
            grid=(Mp // Mt,),
            in_specs=[
                pl.BlockSpec((Mt, H), lambda i: (i, 0)),
                pl.BlockSpec((1, H), lambda i: (0, 0)),
                pl.BlockSpec((1, H), lambda i: (0, 0)),
            ],
            out_specs=pl.BlockSpec((Mt, H), lambda i: (i, 0)),
        ),
        compiler_params=pltpu.CompilerParams(
            dimension_semantics=("parallel",),
            vmem_limit_bytes=_VMEM_LIMIT_BYTES,
        ),
    )(x2, gamma, beta)
    return out[:M] if Mp != M else out


def transformer_encoder(input_ids, params, cfg):
    """Full forward: Embeddings -> N pre-LN encoder layers."""
    B, S = input_ids.shape
    H = cfg["hidden_size"]

    # Embedding gathers (glue, stays in plain JAX).
    tok = jnp.take(params["tok_emb"], input_ids, axis=0)          # (B, S, H)
    pos = params["pos_emb"][:S][None, :, :]                       # (1, S, H)
    x = (tok + pos).astype(jnp.float32)                           # broadcast add
    # Dropout layers: identity (eval mode).

    layers = params["layers"]
    if not layers:
        x2 = pallas_rows_layernorm(x.reshape(B * S, H),
                                   params["emb_ln_g"], params["emb_ln_b"],
                                   eps=cfg["layer_norm_eps"])
        return x2.reshape(B, S, H)

    n_layers = len(layers)
    for li, lp in enumerate(layers):
        # Embedding LayerNorm is fused into the first layer's attention kernel.
        emb_ln = (params["emb_ln_g"], params["emb_ln_b"]) if li == 0 else None
        x = pallas_attention_block(
            x, lp, emb_ln,
            num_heads=cfg["num_attention_heads"],
            ln_eps=1e-5,                      # nn.LayerNorm default inside the layer
            pre_eps=cfg["layer_norm_eps"],    # Embeddings LN uses config eps
        )
        # bf16 inter-layer residual stream; final layer emits f32.
        out_dtype = jnp.float32 if li == n_layers - 1 else jnp.bfloat16
        x = pallas_ffn_block(x.reshape(B * S, H), lp,
                             ln_eps=1e-5, out_dtype=out_dtype).reshape(B, S, H)
    return x


# ----------------------------------------------------------------------------
# Deterministic parameter init (weights pre-laid-out for the kernels)
# ----------------------------------------------------------------------------
def init_params(key, cfg):
    H = cfg["hidden_size"]
    I = cfg["intermediate_size"]
    V = cfg["vocab_size"]
    P = cfg["max_position_embeddings"]
    L = cfg["num_hidden_layers"]
    nh = cfg["num_attention_heads"]
    hd = H // nh

    def nrm(k, shape, scale=0.02):
        return (scale * jax.random.normal(k, shape)).astype(jnp.float32)

    keys = jax.random.split(key, 2 + max(L, 1))
    params = {
        "tok_emb": nrm(keys[0], (V, H)),
        "pos_emb": nrm(keys[1], (P, H)),
        "emb_ln_g": jnp.ones((1, H), jnp.float32),
        "emb_ln_b": jnp.zeros((1, H), jnp.float32),
        "layers": [],
    }
    scale = 1.0 / math.sqrt(hd)
    for li in range(L):
        ks = jax.random.split(keys[2 + li], 6)
        # Stacked QKV weights, columns ordered [q_h0..q_h(nh-1) | k_... | v_...];
        # the 1/sqrt(head_dim) attention scale is folded into the Q slice.
        wq = nrm(ks[0], (H, H)) * scale
        wk = nrm(ks[1], (H, H))
        wv = nrm(ks[2], (H, H))
        params["layers"].append({
            "ln1_g": jnp.ones((1, H), jnp.float32),
            "ln1_b": jnp.zeros((1, H), jnp.float32),
            "wqkv": jnp.concatenate([wq, wk, wv], axis=1).astype(jnp.bfloat16),
            "bqkv": jnp.zeros((1, 3 * H), jnp.float32),
            "wo": nrm(ks[3], (H, H)).astype(jnp.bfloat16),   # rows grouped by head
            "bo": jnp.zeros((1, H), jnp.float32),
            "ln2_g": jnp.ones((1, H), jnp.float32),
            "ln2_b": jnp.zeros((1, H), jnp.float32),
            "w1": nrm(ks[4], (H, I)).astype(jnp.bfloat16),
            "b1": jnp.zeros((1, I), jnp.float32),
            "w2": nrm(ks[5], (I, H)).astype(jnp.bfloat16),
            "b2": jnp.zeros((1, H), jnp.float32),
        })
    return params


if __name__ == "__main__":
    cfg = dict(
        vocab_size=100,
        hidden_size=64,
        num_attention_heads=4,
        intermediate_size=128,
        max_position_embeddings=32,
        num_hidden_layers=2,
        layer_norm_eps=1e-12,
    )
    B, S = 2, 16

    key = jax.random.PRNGKey(0)
    k_ids, k_par = jax.random.split(key)
    input_ids = jax.random.randint(k_ids, (B, S), 0, cfg["vocab_size"], dtype=jnp.int32)
    params = init_params(k_par, cfg)

    out = transformer_encoder(input_ids, params, cfg)
    out = jax.block_until_ready(out)
    assert out.shape == (B, S, cfg["hidden_size"])
    assert out.dtype == jnp.float32
    assert bool(jnp.all(jnp.isfinite(out)))
    print("KERNEL_OK")
</pallas_src>

<mosaic_0001>
module attributes {stable_mosaic.version = 11 : i64} {
  func.func @attention_block_kernel(%arg0: i32, %arg1: memref<1x16x64xf32, #tpu.memory_space<vmem>>, %arg2: memref<1x64xf32, #tpu.memory_space<vmem>>, %arg3: memref<1x64xf32, #tpu.memory_space<vmem>>, %arg4: memref<1x64xf32, #tpu.memory_space<vmem>>, %arg5: memref<1x64xf32, #tpu.memory_space<vmem>>, %arg6: memref<64x192xbf16, #tpu.memory_space<vmem>>, %arg7: memref<1x192xf32, #tpu.memory_space<vmem>>, %arg8: memref<64x64xbf16, #tpu.memory_space<vmem>>, %arg9: memref<1x64xf32, #tpu.memory_space<vmem>>, %arg10: memref<1x16x64xbf16, #tpu.memory_space<vmem>>) attributes {dimension_semantics = [#tpu.dimension_semantics<parallel>], iteration_bounds = array<i64: 2>, scalar_prefetch = 0 : i64, scratch_operands = 0 : i64, tpu.core_type = #tpu.core_type<tc>, window_params = [{transform_indices = @transform_0, window_bounds = array<i64: 1, 16, 64>}, {pipeline_mode = #tpu.pipeline_mode<synchronous>, transform_indices = @transform_1, window_bounds = array<i64: 1, 64>}, {pipeline_mode = #tpu.pipeline_mode<synchronous>, transform_indices = @transform_2, window_bounds = array<i64: 1, 64>}, {pipeline_mode = #tpu.pipeline_mode<synchronous>, transform_indices = @transform_3, window_bounds = array<i64: 1, 64>}, {pipeline_mode = #tpu.pipeline_mode<synchronous>, transform_indices = @transform_4, window_bounds = array<i64: 1, 64>}, {pipeline_mode = #tpu.pipeline_mode<synchronous>, transform_indices = @transform_5, window_bounds = array<i64: 64, 192>}, {pipeline_mode = #tpu.pipeline_mode<synchronous>, transform_indices = @transform_6, window_bounds = array<i64: 1, 192>}, {pipeline_mode = #tpu.pipeline_mode<synchronous>, transform_indices = @transform_7, window_bounds = array<i64: 64, 64>}, {pipeline_mode = #tpu.pipeline_mode<synchronous>, transform_indices = @transform_8, window_bounds = array<i64: 1, 64>}, {transform_indices = @transform_9, window_bounds = array<i64: 1, 16, 64>}]} {
    %c0 = arith.constant 0 : index
    %c0_0 = arith.constant 0 : index
    %c0_1 = arith.constant 0 : index
    %0 = vector.load %arg1[%c0, %c0_0, %c0_1] : memref<1x16x64xf32, #tpu.memory_space<vmem>>, vector<1x16x64xf32>
    %1 = vector.shape_cast %0 : vector<1x16x64xf32> to vector<16x64xf32>
    %c0_2 = arith.constant 0 : index
    %c0_3 = arith.constant 0 : index
    %2 = vector.load %arg2[%c0_2, %c0_3] : memref<1x64xf32, #tpu.memory_space<vmem>>, vector<1x64xf32>
    %3 = vector.shape_cast %2 : vector<1x64xf32> to vector<64xf32>
    %c0_4 = arith.constant 0 : index
    %c0_5 = arith.constant 0 : index
    %4 = vector.load %arg3[%c0_4, %c0_5] : memref<1x64xf32, #tpu.memory_space<vmem>>, vector<1x64xf32>
    %5 = vector.shape_cast %4 : vector<1x64xf32> to vector<64xf32>
    %cst = arith.constant dense<0.000000e+00> : vector<16xf32>
    %6 = vector.multi_reduction <add>, %1, %cst [1] : vector<16x64xf32> to vector<16xf32>
    %7 = vector.shape_cast %6 : vector<16xf32> to vector<16x1xf32>
    %cst_6 = arith.constant 6.400000e+01 : f32
    %8 = vector.broadcast %cst_6 : f32 to vector<16x1xf32>
    %9 = arith.divf %7, %8 : vector<16x1xf32>
    %10 = vector.broadcast %9 : vector<16x1xf32> to vector<16x64xf32>
    %11 = arith.subf %1, %10 : vector<16x64xf32>
    %12 = vector.broadcast %9 : vector<16x1xf32> to vector<16x64xf32>
    %13 = arith.subf %1, %12 : vector<16x64xf32>
    %14 = arith.mulf %11, %13 : vector<16x64xf32>
    %cst_7 = arith.constant dense<0.000000e+00> : vector<16xf32>
    %15 = vector.multi_reduction <add>, %14, %cst_7 [1] : vector<16x64xf32> to vector<16xf32>
    %16 = vector.shape_cast %15 : vector<16xf32> to vector<16x1xf32>
    %cst_8 = arith.constant 6.400000e+01 : f32
    %17 = vector.broadcast %cst_8 : f32 to vector<16x1xf32>
    %18 = arith.divf %16, %17 : vector<16x1xf32>
    %19 = vector.broadcast %9 : vector<16x1xf32> to vector<16x64xf32>
    %20 = arith.subf %1, %19 : vector<16x64xf32>
    %cst_9 = arith.constant 9.99999996E-13 : f32
    %21 = vector.broadcast %cst_9 : f32 to vector<16x1xf32>
    %22 = arith.addf %18, %21 : vector<16x1xf32>
    %23 = math.rsqrt %22 : vector<16x1xf32>
    %24 = vector.broadcast %23 : vector<16x1xf32> to vector<16x64xf32>
    %25 = arith.mulf %20, %24 : vector<16x64xf32>
    %26 = vector.shape_cast %3 : vector<64xf32> to vector<1x64xf32>
    %27 = vector.broadcast %26 : vector<1x64xf32> to vector<16x64xf32>
    %28 = arith.mulf %25, %27 : vector<16x64xf32>
    %29 = vector.shape_cast %5 : vector<64xf32> to vector<1x64xf32>
    %30 = vector.broadcast %29 : vector<1x64xf32> to vector<16x64xf32>
    %31 = arith.addf %28, %30 : vector<16x64xf32>
    %c0_10 = arith.constant 0 : index
    %c0_11 = arith.constant 0 : index
    %32 = vector.load %arg4[%c0_10, %c0_11] : memref<1x64xf32, #tpu.memory_space<vmem>>, vector<1x64xf32>
    %33 = vector.shape_cast %32 : vector<1x64xf32> to vector<64xf32>
    %c0_12 = arith.constant 0 : index
    %c0_13 = arith.constant 0 : index
    %34 = vector.load %arg5[%c0_12, %c0_13] : memref<1x64xf32, #tpu.memory_space<vmem>>, vector<1x64xf32>
    %35 = vector.shape_cast %34 : vector<1x64xf32> to vector<64xf32>
    %cst_14 = arith.constant dense<0.000000e+00> : vector<16xf32>
    %36 = vector.multi_reduction <add>, %31, %cst_14 [1] : vector<16x64xf32> to vector<16xf32>
    %37 = vector.shape_cast %36 : vector<16xf32> to vector<16x1xf32>
    %cst_15 = arith.constant 6.400000e+01 : f32
    %38 = vector.broadcast %cst_15 : f32 to vector<16x1xf32>
    %39 = arith.divf %37, %38 : vector<16x1xf32>
    %40 = vector.broadcast %39 : vector<16x1xf32> to vector<16x64xf32>
    %41 = arith.subf %31, %40 : vector<16x64xf32>
    %42 = vector.broadcast %39 : vector<16x1xf32> to vector<16x64xf32>
    %43 = arith.subf %31, %42 : vector<16x64xf32>
    %44 = arith.mulf %41, %43 : vector<16x64xf32>
    %cst_16 = arith.constant dense<0.000000e+00> : vector<16xf32>
    %45 = vector.multi_reduction <add>, %44, %cst_16 [1] : vector<16x64xf32> to vector<16xf32>
    %46 = vector.shape_cast %45 : vector<16xf32> to vector<16x1xf32>
    %cst_17 = arith.constant 6.400000e+01 : f32
    %47 = vector.broadcast %cst_17 : f32 to vector<16x1xf32>
    %48 = arith.divf %46, %47 : vector<16x1xf32>
    %49 = vector.broadcast %39 : vector<16x1xf32> to vector<16x64xf32>
    %50 = arith.subf %31, %49 : vector<16x64xf32>
    %cst_18 = arith.constant 9.99999974E-6 : f32
    %51 = vector.broadcast %cst_18 : f32 to vector<16x1xf32>
    %52 = arith.addf %48, %51 : vector<16x1xf32>
    %53 = math.rsqrt %52 : vector<16x1xf32>
    %54 = vector.broadcast %53 : vector<16x1xf32> to vector<16x64xf32>
    %55 = arith.mulf %50, %54 : vector<16x64xf32>
    %56 = vector.shape_cast %33 : vector<64xf32> to vector<1x64xf32>
    %57 = vector.broadcast %56 : vector<1x64xf32> to vector<16x64xf32>
    %58 = arith.mulf %55, %57 : vector<16x64xf32>
    %59 = vector.shape_cast %35 : vector<64xf32> to vector<1x64xf32>
    %60 = vector.broadcast %59 : vector<1x64xf32> to vector<16x64xf32>
    %61 = arith.addf %58, %60 : vector<16x64xf32>
    %62 = arith.truncf %61 : vector<16x64xf32> to vector<16x64xbf16>
    %c0_19 = arith.constant 0 : index
    %c0_20 = arith.constant 0 : index
    %63 = vector.load %arg6[%c0_19, %c0_20] : memref<64x192xbf16, #tpu.memory_space<vmem>>, vector<64x192xbf16>
    %cst_21 = arith.constant dense<0.000000e+00> : vector<16x192xf32>
    %64 = tpu.matmul %62, %63, %cst_21 {dimension_numbers = #tpu.dot_dimension_numbers<[1], [0], [0], [1], [0, 0, 1, 1], [], []>} : vector<16x64xbf16>, vector<64x192xbf16>, vector<16x192xf32> -> vector<16x192xf32>
    %c0_22 = arith.constant 0 : index
    %c0_23 = arith.constant 0 : index
    %65 = vector.load %arg7[%c0_22, %c0_23] : memref<1x192xf32, #tpu.memory_space<vmem>>, vector<1x192xf32>
    %66 = vector.shape_cast %65 : vector<1x192xf32> to vector<192xf32>
    %67 = vector.shape_cast %66 : vector<192xf32> to vector<1x192xf32>
    %68 = vector.broadcast %67 : vector<1x192xf32> to vector<16x192xf32>
    %69 = arith.addf %64, %68 : vector<16x192xf32>
    %70 = vector.shape_cast %69 : vector<16x192xf32> to vector<16x12x16xf32>
    %71 = tpu.transpose %70, [1, 0, 2] : vector<16x12x16xf32> -> vector<12x16x16xf32>
    %72 = vector.extract_strided_slice %71 {offsets = [0, 0, 0], sizes = [4, 16, 16], strides = [1, 1, 1]} : vector<12x16x16xf32> to vector<4x16x16xf32>
    %73 = vector.extract_strided_slice %71 {offsets = [4, 0, 0], sizes = [4, 16, 16], strides = [1, 1, 1]} : vector<12x16x16xf32> to vector<4x16x16xf32>
    %74 = vector.extract_strided_slice %71 {offsets = [8, 0, 0], sizes = [4, 16, 16], strides = [1, 1, 1]} : vector<12x16x16xf32> to vector<4x16x16xf32>
    %c0_24 = arith.constant 0 : index
    %c0_25 = arith.constant 0 : index
    %75 = vector.load %arg8[%c0_24, %c0_25] : memref<64x64xbf16, #tpu.memory_space<vmem>>, vector<64x64xbf16>
    %cst_26 = arith.constant 0.000000e+00 : f32
    %76 = vector.broadcast %cst_26 : f32 to vector<16x64xf32>
    %77 = arith.truncf %72 : vector<4x16x16xf32> to vector<4x16x16xbf16>
    %78 = arith.truncf %73 : vector<4x16x16xf32> to vector<4x16x16xbf16>
    %79 = arith.truncf %74 : vector<4x16x16xf32> to vector<4x16x16xbf16>
    "tpu.trace_start"() <{level = 10 : i32, message = "hqd,hkd->hqk"}> : () -> ()
    %cst_27 = arith.constant dense<0.000000e+00> : vector<4x16x16xf32>
    %80 = tpu.matmul %77, %78, %cst_27 {dimension_numbers = #tpu.dot_dimension_numbers<[2], [2], [1], [1], [0, 0, 0, 1, 1, 1], [0], [0]>} : vector<4x16x16xbf16>, vector<4x16x16xbf16>, vector<4x16x16xf32> -> vector<4x16x16xf32>
    "tpu.trace_stop"() : () -> ()
    %cst_28 = arith.constant dense<0xFF800000> : vector<4x16xf32>
    %81 = vector.multi_reduction <maximumf>, %80, %cst_28 [2] : vector<4x16x16xf32> to vector<4x16xf32>
    %82 = vector.shape_cast %81 : vector<4x16xf32> to vector<4x16x1xf32>
    %83 = vector.broadcast %82 : vector<4x16x1xf32> to vector<4x16x16xf32>
    %84 = arith.subf %80, %83 : vector<4x16x16xf32>
    %85 = math.exp %84 : vector<4x16x16xf32>
    %cst_29 = arith.constant dense<0.000000e+00> : vector<4x16xf32>
    %86 = vector.multi_reduction <add>, %85, %cst_29 [2] : vector<4x16x16xf32> to vector<4x16xf32>
    %87 = vector.shape_cast %86 : vector<4x16xf32> to vector<4x16x1xf32>
    %88 = tpu.reciprocal %87 {approx = true} : vector<4x16x1xf32> -> vector<4x16x1xf32>
    %89 = vector.broadcast %88 : vector<4x16x1xf32> to vector<4x16x16xf32>
    %90 = arith.mulf %85, %89 : vector<4x16x16xf32>
    %91 = arith.truncf %90 : vector<4x16x16xf32> to vector<4x16x16xbf16>
    "tpu.trace_start"() <{level = 10 : i32, message = "hqk,hkd->hqd"}> : () -> ()
    %cst_30 = arith.constant dense<0.000000e+00> : vector<4x16x16xf32>
    %92 = tpu.matmul %91, %79, %cst_30 {dimension_numbers = #tpu.dot_dimension_numbers<[2], [1], [1], [2], [0, 0, 0, 1, 1, 2], [0], [0]>} : vector<4x16x16xbf16>, vector<4x16x16xbf16>, vector<4x16x16xf32> -> vector<4x16x16xf32>
    "tpu.trace_stop"() : () -> ()
    %93 = tpu.transpose %92, [1, 0, 2] : vector<4x16x16xf32> -> vector<16x4x16xf32>
    %94 = vector.shape_cast %93 : vector<16x4x16xf32> to vector<16x64xf32>
    %95 = arith.truncf %94 : vector<16x64xf32> to vector<16x64xbf16>
    %cst_31 = arith.constant dense<0.000000e+00> : vector<16x64xf32>
    %96 = tpu.matmul %95, %75, %cst_31 {dimension_numbers = #tpu.dot_dimension_numbers<[1], [0], [0], [1], [0, 0, 1, 1], [], []>} : vector<16x64xbf16>, vector<64x64xbf16>, vector<16x64xf32> -> vector<16x64xf32>
    %97 = arith.addf %76, %96 : vector<16x64xf32>
    %c0_32 = arith.constant 0 : index
    %c0_33 = arith.constant 0 : index
    %98 = vector.load %arg9[%c0_32, %c0_33] : memref<1x64xf32, #tpu.memory_space<vmem>>, vector<1x64xf32>
    %99 = vector.shape_cast %98 : vector<1x64xf32> to vector<64xf32>
    %100 = vector.shape_cast %99 : vector<64xf32> to vector<1x64xf32>
    %101 = vector.broadcast %100 : vector<1x64xf32> to vector<16x64xf32>
    %102 = arith.addf %97, %101 : vector<16x64xf32>
    %103 = arith.addf %31, %102 : vector<16x64xf32>
    %104 = arith.truncf %103 : vector<16x64xf32> to vector<16x64xbf16>
    %c0_34 = arith.constant 0 : index
    %c0_35 = arith.constant 0 : index
    %c0_36 = arith.constant 0 : index
    %105 = vector.load %arg10[%c0_34, %c0_35, %c0_36] : memref<1x16x64xbf16, #tpu.memory_space<vmem>>, vector<1x16x64xbf16>
    %106 = vector.shape_cast %105 : vector<1x16x64xbf16> to vector<16x64xbf16>
    %107 = vector.shape_cast %104 : vector<16x64xbf16> to vector<1x16x64xbf16>
    tpu.vector_store %arg10[%c0_34, %c0_35, %c0_36], %107 {strides = array<i32>} : memref<1x16x64xbf16, #tpu.memory_space<vmem>>, vector<1x16x64xbf16>,
    return
  }
  func.func @transform_0(%arg0: i32) -> (i32, i32, i32) {
    %c0_i32 = arith.constant 0 : i32
    %c0_i32_0 = arith.constant 0 : i32
    %c0_i32_1 = arith.constant 0 : i32
    return %arg0, %c0_i32, %c0_i32_0 : i32, i32, i32
  }
  func.func @transform_1(%arg0: i32) -> (i32, i32) {
    %c0_i32 = arith.constant 0 : i32
    %c0_i32_0 = arith.constant 0 : i32
    %c0_i32_1 = arith.constant 0 : i32
    return %c0_i32, %c0_i32_0 : i32, i32
  }
  func.func @transform_2(%arg0: i32) -> (i32, i32) {
    %c0_i32 = arith.constant 0 : i32
    %c0_i32_0 = arith.constant 0 : i32
    %c0_i32_1 = arith.constant 0 : i32
    return %c0_i32, %c0_i32_0 : i32, i32
  }
  func.func @transform_3(%arg0: i32) -> (i32, i32) {
    %c0_i32 = arith.constant 0 : i32
    %c0_i32_0 = arith.constant 0 : i32
    %c0_i32_1 = arith.constant 0 : i32
    return %c0_i32, %c0_i32_0 : i32, i32
  }
  func.func @transform_4(%arg0: i32) -> (i32, i32) {
    %c0_i32 = arith.constant 0 : i32
    %c0_i32_0 = arith.constant 0 : i32
    %c0_i32_1 = arith.constant 0 : i32
    return %c0_i32, %c0_i32_0 : i32, i32
  }
  func.func @transform_5(%arg0: i32) -> (i32, i32) {
    %c0_i32 = arith.constant 0 : i32
    %c0_i32_0 = arith.constant 0 : i32
    %c0_i32_1 = arith.constant 0 : i32
    return %c0_i32, %c0_i32_0 : i32, i32
  }
  func.func @transform_6(%arg0: i32) -> (i32, i32) {
    %c0_i32 = arith.constant 0 : i32
    %c0_i32_0 = arith.constant 0 : i32
    %c0_i32_1 = arith.constant 0 : i32
    return %c0_i32, %c0_i32_0 : i32, i32
  }
  func.func @transform_7(%arg0: i32) -> (i32, i32) {
    %c0_i32 = arith.constant 0 : i32
    %c0_i32_0 = arith.constant 0 : i32
    %c0_i32_1 = arith.constant 0 : i32
    return %c0_i32, %c0_i32_0 : i32, i32
  }
  func.func @transform_8(%arg0: i32) -> (i32, i32) {
    %c0_i32 = arith.constant 0 : i32
    %c0_i32_0 = arith.constant 0 : i32
    %c0_i32_1 = arith.constant 0 : i32
    return %c0_i32, %c0_i32_0 : i32, i32
  }
  func.func @transform_9(%arg0: i32) -> (i32, i32, i32) {
    %c0_i32 = arith.constant 0 : i32
    %c0_i32_0 = arith.constant 0 : i32
    %c0_i32_1 = arith.constant 0 : i32
    return %arg0, %c0_i32, %c0_i32_0 : i32, i32, i32
  }
}

</mosaic_0001>

<bundles_post_ra>
// kernel: tpu_custom_call.1
= control target key start
LH: loop header
LB: loop body
LE: loop exit
PB: predicated region body
PF: predicated region fallthrough
CT: control target
= control target key end

     0   :  { %s3621_s0 = inlined_call_operand.hbm [shape: f32[2,16,64], index: 0, kind: input, shape index: {}]   ;;  %s3622_s1 = inlined_call_operand.vmem [shape: f32[1,64], index: 1, kind: input, shape index: {}]   ;;  %s3623_s2 = inlined_call_operand.hbm [shape: f32[1,64], index: 2, kind: input, shape index: {}]   ;;  %s3624_s3 = inlined_call_operand.vmem [shape: f32[1,64], index: 3, kind: input, shape index: {}]   ;;  %s3625_s4 = inlined_call_operand.vmem [shape: f32[1,64], index: 4, kind: input, shape index: {}]   ;;  %s3626_s5 = inlined_call_operand.hbm [shape: bf16[64,192], index: 5, kind: input, shape index: {}]   ;;  %s3627_s6 = inlined_call_operand.vmem [shape: f32[1,192], index: 6, kind: input, shape index: {}]   ;;  %s3628_s7 = inlined_call_operand.hbm [shape: bf16[64,64], index: 7, kind: input, shape index: {}]   ;;  %s3629_s8 = inlined_call_operand.vmem [shape: f32[1,64], index: 8, kind: input, shape index: {}]   ;;  %s3630_s9 = inlined_call_operand.hbm [shape: bf16[2,16,64], index: 9, kind: output, shape index: {}]  }
   0x1   :  { %3637 = sst [smem:[#allocation15_spill]] %s3623_s2 }
   0x2   :  { %3638 = sst [smem:[#allocation16_spill]] %s3626_s5 }
   0x3   :  { %3639 = sst [smem:[#allocation17_spill]] %s3628_s7 }
   0x4   :  { %14 = vsyncpa [#allocation3], 0 }
   0x5   :  { %16 = vsyncpa [#allocation3 + $0x1], 0 }
   0x6   :  { %17 = vsyncpa [#allocation6], 0 }
   0x7   :  { %18 = vsyncpa [#allocation9], 0 }
   0x8   :  { %19 = vsyncpa [#allocation4], 0 }
   0x9   :  { %21 = vsyncpa [#allocation4 + $0x1], 0  ;;  %s3034_s30 = smov 0   ;;  %s3036_s10 = smov 0  }
   0xa   :  { %s3038_s11 = smov 0   ;;  %s3040_s12 = smov 0  }
   0xb LB: > { %s3055_s13 = sadd.s32 4294967295, %s2960_s12   ;;  %s2459_s14 = sadd.s32 4294967294, %s2960_s12   ;;  %s2960_s12 = sphi %s3040_s12, %s3663_s12   ;;  %s2956_s11 = sphi %s3038_s11, %s3662_s11   ;;  %s2952_s10 = sphi %s3036_s10, %s3661_s10   ;;  %s2948_s30 = sphi %s3034_s30, %s3660_s30  }
   0xc   : > { %p47_p0 = scmp.ne.s32.totalorder %s2952_s10, %s2948_s30  ;;  %p3631_p1 = scmp.eq.s32.totalorder %s3055_s13, 0 }
   0xd   : > { %p239_p2 = scmp.eq.s32.totalorder %s3055_s13, 1  ;;  %p245_p3 = scmp.eq.s32.totalorder %s2459_s14, 1 }
   0xe   : > { %p3064_p4 = por %p3631_p1, %p47_p0  ;;  %p2460_p5 = scmp.ge.s32.totalorder %s2960_s12, 1 }
   0xf   : > { %p3069_p6 = por %p245_p3, %p47_p0  ;;  %p252_p7 = scmp.lt.s32.totalorder %s2960_s12, 3 }
  0x10   : > { %s3640_s15 = scalar_select %p3064_p4, 1, 0 }
  0x11   : > { %s3641_s16 = scalar_select %p3069_p6, 1, 0 }
  0x12   : > { %p3074_p8 = pnand %p2460_p5, %p252_p7  ;;  %s2962_s18 = smov [#allocation5]  }
  0x13   : > { %s268_s19 = sshll.u32 %s2962_s18, 4  ;;  %s2963_s20 = smov [#allocation7]   ;;  %s269_s19 = int_to_ptr.vmem [resolvable:$true] %s268_s19 }
  0x14   : > { %s3642_s17 = scalar_select %p3074_p8, 1, 0 }
  0x15   : > { %p2633_p10 = pneg %p3074_p8  ;;  %s284_s21 = sshll.u32 %s2963_s20, 4  ;;  %s3087_s21 = int_to_ptr.vmem [resolvable:$true] %s284_s21 }
  0x16   : > { %s2964_s23 = smov [#allocation8]   ;;  %s2793_s25 = scalar_lea.vmem %s269_s19, 16 }
  0x17   : > { %p3083_p11 = pnand %p2633_p10, %p3631_p1  ;;  %s300_s24 = sshll.u32 %s2964_s23, 4  ;;  %s301_s24 = int_to_ptr.vmem [resolvable:$true] %s300_s24 }
  0x18   : > { %p2794_p13 = scmp.ne.s32.totalorder %s269_s19, %s2793_s25  ;;  %s2800_s26 = scalar_lea.vmem %s269_s19, 32 }
  0x19   : > { %p2784_p12 = pneg %p3083_p11  ;;  %p2801_p5 = scmp.lt.s32.totalorder %s269_s19, %s269_s19 }
  0x1a   : > { %p2802_p7 = scmp.lt.s32.totalorder %s2800_s26, %s2793_s25 }
  0x1b   : > { %p2796_p0 = pnand %p2794_p13, %p2784_p12 }
  0x1c   : > { %p2803_p10 = por %p2802_p7, %p2801_p5 }
  0x1d   : > { %p2797_p3 = pneg %p2796_p0 }
  0x1f   : > { %p2804_p9 = pnand %p2803_p10, %p2797_p3 }
  0x21   : > { %2807 = shalt.err (!%p2804_p9)
}
  0x22   : > { %s3644_s2 = sld [smem:[#allocation15_spill]]  ;;  %s2819_s29 = scalar_lea.vmem %s3087_s21, 1024 }
  0x23   : > { %p2820_p1 = scmp.ne.s32.totalorder %s3087_s21, %s2819_s29  ;;  %p2827_p5 = scmp.lt.s32.totalorder %s3087_s21, %s3087_s21 }
  0x24   : > { %p2828_p3 = scmp.lt.s32.totalorder %s2819_s29, %s2819_s29 }
  0x25   : > { %p2822_p13 = pnand %p2820_p1, %p2784_p12 }
  0x26   : > { %p2829_p9 = por %p2828_p3, %p2827_p5 }
  0x27   : > { %p2823_p0 = pneg %p2822_p13 }
  0x28   : > { %2636 = dma.hbm_to_vmem [thread:$0]  (!%p3083_p11), %s3644_s2, 16, %s269_s19, [#allocation6]  }
  0x29   : > { %p2830_p7 = pnand %p2829_p9, %p2823_p0 }
  0x2b   : > { %2833 = shalt.err (!%p2830_p7)
}
  0x2c   : > { %s3632_s14 = smov 128   ;;  %s3633_s18 = smov 8  }
  0x2d   : > { %s3645_s5 = sld [smem:[#allocation16_spill]]  ;;  %s2845_s23 = scalar_lea.vmem %s301_s24, 512 }
  0x2e   : > { %p2846_p1 = scmp.ne.s32.totalorder %s301_s24, %s2845_s23  ;;  %p2853_p0 = scmp.lt.s32.totalorder %s301_s24, %s301_s24 }
  0x2f   : > { %p2854_p5 = scmp.lt.s32.totalorder %s2845_s23, %s2845_s23 }
  0x30   : > { %p2848_p10 = pnand %p2846_p1, %p2784_p12 }
  0x31   : > { %p2855_p3 = por %p2854_p5, %p2853_p0 }
  0x32   : > { %p2849_p13 = pneg %p2848_p10 }
  0x33   : > { %2639 = dma.hbm_to_vmem [thread:$0]  (!%p3083_p11), %s3645_s5, 1024, %s3087_s21, [#allocation6], %s3632_s14, %s3632_s14, %s3633_s18  }
  0x34   : > { %p2856_p9 = pnand %p2855_p3, %p2849_p13 }
  0x36   : > { %2859 = shalt.err (!%p2856_p9)
}
  0x37   : > { %s2967_s25 = smov 64   ;;  %s2968_s21 = smov 4  }
  0x38   : > { %s3646_s7 = sld [smem:[#allocation17_spill]]  ;;  %s3124_s28 = sadd.s32 1, %s2960_s12  }
  0x39   : > { %s31_s29 = ssub.s32 %s2960_s12, %s3124_s28  ;;  %s34_s19 = sadd.s32 1, %s2956_s11 }
  0x3a   : > { %p32_p12 = scmp.eq.s32.totalorder %s31_s29, 0  ;;  %p41_p7 = scmp.ne.s32.totalorder %s2956_s11, %s2952_s10 }
  0x3b   : > { %p42_p1 = scmp.eq.s32.totalorder %s2960_s12, 0  ;;  %p2654_p10 = scmp.lt.s32.totalorder %s2960_s12, 2 }
  0x3c   : > { %s3134_s20 = scalar_select %p32_p12, %s2956_s11, %s34_s19  }
  0x3d   : > { %p43_p13 = por %p42_p1, %p41_p7  ;;  %p3138_p0 = por %p239_p2, %p41_p7 }
  0x3e   : > { %2642 = dma.hbm_to_vmem [thread:$0]  (!%p3083_p11), %s3646_s7, 512, %s301_s24, [#allocation9], %s2967_s25, %s2967_s25, %s2968_s21  }
  0x3f   : > { %s3647_s23 = scalar_select %p3138_p0, 1, 0 }
  0x40   : > { %s317_s22 = sand.u32 1, %s2956_s11   ;;  %s2532_s26 = sshll.u32 %s2960_s12, 8 }
  0x41   : > { %s2465_s24 = sshll.u32 %s317_s22, 4  ;;  %s3147_s27 = scalar_lea.hbm %s3621_s0, %s2532_s26 }
  0x42   : > { %s321_s29 = scalar_lea.vmem [#allocation2], %s2465_s24  ;;  %p3149_p11 = pnand %p2654_p10, %p43_p13 }
  0x43   : > { %s328_s19 = sshll.u32 %s321_s29, 4  ;;  %s3155_s18 = scalar_lea.sflag [#allocation3], %s317_s22  ;;  %s3153_s19 = int_to_ptr.vmem [resolvable:$true] %s328_s19 }
  0x44   : > { %s2860_s2 = scalar_lea.hbm %s3147_s27, 256  ;;  %p2862_p5 = pneg %p3149_p11 }
  0x45   : > { %p2861_p2 = scmp.ne.s32.totalorder %s3147_s27, %s2860_s2  ;;  %s2865_s24 = scalar_lea.hbm %s3621_s0, 512 }
  0x46   : > { %p2866_p12 = scmp.lt.s32.totalorder %s3147_s27, %s3621_s0  ;;  %p2867_p7 = scmp.lt.s32.totalorder %s2865_s24, %s2860_s2 }
  0x47   : > { %p2863_p3 = pnand %p2862_p5, %p2861_p2 }
  0x48   : > { %p2868_p1 = por %p2867_p7, %p2866_p12 }
  0x49   : > { %p2864_p9 = pneg %p2863_p3 }
  0x4b   : > { %p2869_p10 = pnand %p2868_p1, %p2864_p9 }
  0x4d   : > { %2872 = shalt.err (!%p2869_p10)
}
  0x4e   : > { %s2873_s22 = scalar_lea.vmem %s3153_s19, 256  ;;  %s2969_s5 = smov [#allocation2]  }
  0x4f   : > { %p2874_p13 = scmp.ne.s32.totalorder %s3153_s19, %s2873_s22  ;;  %s2878_s7 = sshll.u32 %s2969_s5, 4  ;;  %s2879_s7 = int_to_ptr.vmem [resolvable:$false] %s2878_s7 }
  0x50   : > { %s2880_s26 = scalar_lea.vmem %s2879_s7, 512  ;;  %p2881_p3 = scmp.lt.s32.totalorder %s3153_s19, %s2879_s7 }
  0x51   : > { %p2876_p6 = pnand %p2874_p13, %p2862_p5  ;;  %p2882_p0 = scmp.lt.s32.totalorder %s2880_s26, %s2873_s22 }
  0x53   : > { %p2877_p2 = pneg %p2876_p6  ;;  %p2883_p4 = por %p2882_p0, %p2881_p3 }
  0x55   : > { %p2884_p8 = pnand %p2883_p4, %p2877_p2 }
  0x57   : > { %2887 = shalt.err (!%p2884_p8)
}
  0x58   : > { %s3649_s2 = smov 8   ;;  %s3650_s25 = smov 128  }
  0x59   : > { %2646 = dma.hbm_to_vmem [thread:$0]  (!%p3149_p11), %s3147_s27, 256, %s3153_s19, %s3155_s18, %s3650_s25, %s3650_s25, %s3649_s2  }
  0x5a   : > { %p3651_p6 = scmp.ne.s32.totalorder %s3642_s17, 0 }
  0x5b   : > { %s3182_s5 = sand.u32 (!%p3651_p6), 1, %s2952_s10   ;;  %p3652_p4 = scmp.ne.s32.totalorder (!%p3651_p6), %s3640_s15, 0 }
  0x5c   : > { %340 = sbr.rel (%p3651_p6) target bundleno = 2231 (0x8b7), region = 56  ;;  %s2469_s7 = sshll.u32 (!%p3651_p6), %s3182_s5, 4 }
  0x5d   : > { %s343_s24 = scalar_lea.sflag (!%p3651_p6), [#allocation3], %s3182_s5  ;;  %s346_s21 = scalar_lea.vmem (!%p3651_p6), [#allocation2], %s2469_s7 }
  0x61   : > { %2931 = dma.done.wait (%p3652_p4), %s343_s24, 256  }
  0x62   : > { %2933 = vsyncadd (%p3652_p4), %s343_s24, 4294967040  ;;  %p3653_p8 = scmp.eq.s32.totalorder %s3055_s13, 0 }
  0x64   : > { %2935 = dma.done.wait (%p3653_p8), [#allocation6], 1040   ;;  %p3654_p0 = pmov %p3653_p8 }
  0x66   : > { %2937 = vsyncadd (%p3654_p0), [#allocation6], 4294966256  ;;  %p3655_p11 = pmov %p3654_p0 }
  0x67   : > { %p3656_p5 = pmov %p3654_p0 }
  0x68   : > { %2939 = dma.done.wait (%p3655_p11), [#allocation9], 512  }
  0x69   : > { %2941 = vsyncadd (%p3656_p5), [#allocation9], 4294966784  ;;  %vm398_vm0 = vcmask 523264   ;;  %v394_v0 = vld [vmem:[%s346_s21] sm:$0xff]  ;;  %v395_v1 = vld [vmem:[%s346_s21 + $0x8] sm:$0xff]  ;;  %v2970_v46 = vmov 0  }
  0x6a   : > { %v399_v2 = vsel %vm398_vm0, %v394_v0, 0.0  ;;  %v402_v3 = vsel %vm398_vm0, %v395_v1, 0.0  ;;  %v2474_v21 = vld [vmem:[%s3622_s1] ss:$0 sm:$0xff]  ;;  %v2728_v43 = vld [vmem:[#allocation7 + $0x30] ss:$8 sps:$4 sm:$0xff]   ;;  %582 = vmatprep.mubr.bf16.mxu0 %v2970_v46 }
  0x6b   : > { %400 = vadd.xlane.f32.xlu0 %v399_v2  ;;  %v2475_v23 = vld [vmem:[#allocation5] ss:$0 sm:$0xff]  ;;  %v2729_v44 = vld [vmem:[#allocation7 + $0x24] ss:$8 sps:$4 sm:$0xff]   ;;  %v2731_v45 = vld [vmem:[#allocation7 + $0x20] ss:$8 sps:$4 sm:$0xff]  }
  0x6c   : > { %v2726_v42 = vld [vmem:[#allocation7 + $0x34] ss:$8 sps:$4 sm:$0xff]   ;;  %v2734_v48 = vld [vmem:[#allocation7 + $0x10] ss:$8 sps:$4 sm:$0xff]   ;;  %v2735_v49 = vld [vmem:[#allocation7 + $0x4] ss:$8 sps:$4 sm:$0xff]  }
  0x6d   : > { %558 = vmatprep.subr.bf16.mxu0 %v2726_v42  ;;  %v2732_v47 = vld [vmem:[#allocation7 + $0x14] ss:$8 sps:$4 sm:$0xff]   ;;  %v2737_v50 = vld [vmem:[#allocation7] ss:$8 sps:$4 sm:$0xff]   ;;  %s2971_s26 = smov 48   ;;  %s2972_s2 = smov 64  }
  0x6e   : > { %559 = vmatpush1.bf16.msra.mxu0 %v2728_v43  ;;  %v2476_v59 = vld [vmem:[%s3624_s3] ss:$0 sm:$0xff]  ;;  %s2973_s25 = smov 32   ;;  %s2974_s7 = smov 16   ;;  %vm2979_vm1 = vmmov 0   ;;  %vm1493_vm2 = vcmask 130048  }
  0x6f   : > { %403 = vadd.xlane.f32.xlu0 %v402_v3  ;;  %560 = vmatprep.subr.bf16.mxu0 %v2729_v44  ;;  %v2477_v63 = vld [vmem:[%s3625_s4] ss:$0 sm:$0xff]  ;;  %s2975_s24 = smov 112   ;;  %s2976_s21 = smov 96   ;;  %vm2248_vm3 = vcmask 261120   ;;  %vm2251_vm4 = vcmask 392192  }
  0x70   : > { %s2977_s15 = smov 80   ;;  %s2473_s18 = sshll.u32 %s3182_s5, 3  ;;  %vm2340_vm5 = vcmask 519168  }
  0x71   : > { %s2535_s27 = sshll.u32 %s3055_s13, 7  ;;  %s392_s19 = scalar_lea.vmem [#allocation10], %s2473_s18 }
  0x72   : > { %561 = vmatpush1.bf16.msra.mxu0 %v2731_v45  ;;  %s2357_s29 = sshll.u32 %s392_s19, 4  ;;  %p3657_p12 = scmp.ne.s32.totalorder %s3647_s23, 0  ;;  %s3576_s29 = int_to_ptr.vmem [resolvable:$true] %s2357_s29 }
  0x73   : > { %562 = vmatprep.subr.bf16.mxu0 %v2732_v47  ;;  %s2888_s13 = scalar_lea.vmem %s3576_s29, 128 }
  0x74   : > { %p2889_p9 = scmp.ne.s32.totalorder %s3576_s29, %s2888_s13 }
  0x76   : > { %563 = vmatpush1.bf16.msra.mxu0 %v2734_v48  ;;  %p2890_p7 = pnand %p2889_p9, %p3657_p12 }
  0x77   : > { %564 = vmatprep.subr.bf16.mxu0 %v2735_v49 }
  0x78   : > { %p2891_p1 = pneg %p2890_p7 }
  0x7a   : > { %565 = vmatpush1.bf16.msra.mxu0 %v2737_v50 }
  0xf4   : > { %v401_v4 = vpop.xlane.xlu0 %400 }
  0xf5   : > { %v406_v5 = vmul.f32 0.015625, %v401_v4  ;;  %v497_v4 = vlaneseq }
  0xf7   : > { %v408_v6 = vsub.f32 %v394_v0, %v406_v5  ;;  %v3224_v5 = vshrl.u32 %v497_v4, 7 }
  0xf8   : > { %v404_v7 = vpop.xlane.xlu0 %403 }
  0xf9   : > { %v407_v8 = vmul.f32 0.015625, %v404_v7  ;;  %v410_v9 = vmul.f32 %v408_v6, %v408_v6  ;;  %v3230_v7 = vld [vmem:[%s3627_s6] sm:$0x3] }
  0xfb   : > { %v409_v10 = vsub.f32 %v395_v1, %v407_v8  ;;  %v412_v11 = vsel %vm398_vm0, %v410_v9, 0.0 }
  0xfc   : > { %413 = vadd.xlane.f32.xlu1 %v412_v11 }
  0xfd   : > { %v411_v12 = vmul.f32 %v409_v10, %v409_v10 }
  0xff   : > { %v415_v13 = vsel %vm398_vm0, %v411_v12, 0.0 }
 0x100   : > { %416 = vadd.xlane.f32.xlu1 %v415_v13 }
 0x185   : > { %v414_v14 = vpop.xlane.xlu1 %413 }
 0x186   : > { %v418_v15 = vmul.f32 0.015625, %v414_v14  ;;  %v2978_v14 = vmov 0.0  }
 0x187   : > { %2557 = vmatprep.subr.bf16.mxu1 %v2978_v14  ;;  %2581 = vmatprep.subr.bf16.mxu0 %v2978_v14 }
 0x188   : > { %v420_v16 = vadd.f32 1e-12, %v418_v15  ;;  %2559 = vmatprep.mubr.msk.bf16.mxu1 %vm2979_vm1, %v2978_v14  ;;  %v2980_v15 = vmov 1983009808  }
 0x189   : > { %v417_v17 = vpop.xlane.xlu1 %416 }
 0x18a   : > { %2742 = vrsqrt.f32 %v420_v16  ;;  %v419_v18 = vmul.f32 0.015625, %v417_v17  ;;  %v660_v16 = vunpack.c.l.s4 %v2980_v15 }
 0x18c   : > { %v421_v19 = vadd.f32 1e-12, %v419_v18 }
 0x18e   : > { %2744 = vrsqrt.f32 %v421_v19  ;;  %v2981_v19 = vmov 1934713408  }
 0x197   : > { %v2743_v20 = vpop.eup %2742 }
 0x198   : > { %v424_v22 = vmul.f32 %v2743_v20, %v408_v6  ;;  %v499_v6 = vsub.s32 0, %v3224_v5  ;;  %v724_v20 = vunpack.c.l.s4 %v2981_v19 }
 0x19a   : > { %v432_v24 = vmul.f32 %v2474_v21, %v424_v22  ;;  %v500_v8 = vrot.slane %v3230_v7, %v499_v6 }
 0x19b   : > { %v2745_v25 = vpop.eup %2744 }
 0x19c   : > { %v3205_v26 = vadd.f32 %v2475_v23, %v432_v24  ;;  %v425_v27 = vmul.f32 %v2745_v25, %v409_v10  ;;  %v725_v24 = vunpack.c.0.s8 %v724_v20 }
 0x19e   : > { %v444_v28 = vsel %vm398_vm0, %v3205_v26, 0.0  ;;  %v433_v29 = vmul.f32 %v2474_v21, %v425_v27  ;;  %v661_v21 = vunpack.c.0.s8 %v660_v16 }
 0x19f   : > { %445 = vadd.xlane.f32.xlu0 %v444_v28 }
 0x1a0   : > { %v3209_v30 = vadd.f32 %v2475_v23, %v433_v29  ;;  %v3274_v25 = vsub.s32 %v661_v21, %v3224_v5 }
 0x1a2   : > { %v447_v31 = vsel %vm398_vm0, %v3209_v30, 0.0 }
 0x1a3   : > { %448 = vadd.xlane.f32.xlu1 %v447_v31 }
 0x228   : > { %v446_v32 = vpop.xlane.xlu0 %445 }
 0x229   : > { %v450_v33 = vmul.f32 0.015625, %v446_v32 }
 0x22b   : > { %v452_v34 = vsub.f32 %v3205_v26, %v450_v33 }
 0x22c   : > { %v449_v35 = vpop.xlane.xlu1 %448 }
 0x22d   : > { %v451_v36 = vmul.f32 0.015625, %v449_v35  ;;  %v454_v37 = vmul.f32 %v452_v34, %v452_v34 }
 0x22f   : > { %v453_v38 = vsub.f32 %v3209_v30, %v451_v36  ;;  %v456_v39 = vsel %vm398_vm0, %v454_v37, 0.0 }
 0x230   : > { %457 = vadd.xlane.f32.xlu0 %v456_v39 }
 0x231   : > { %v455_v40 = vmul.f32 %v453_v38, %v453_v38 }
 0x233   : > { %v459_v41 = vsel %vm398_vm0, %v455_v40, 0.0 }
 0x234   : > { %460 = vadd.xlane.f32.xlu1 %v459_v41 }
 0x2b9   : > { %v458_v51 = vpop.xlane.xlu0 %457 }
 0x2ba   : > { %v462_v52 = vmul.f32 0.015625, %v458_v51 }
 0x2bc   : > { %v464_v53 = vadd.f32 1e-05, %v462_v52 }
 0x2bd   : > { %v461_v54 = vpop.xlane.xlu1 %460 }
 0x2be   : > { %2746 = vrsqrt.f32 %v464_v53  ;;  %v463_v55 = vmul.f32 0.015625, %v461_v54 }
 0x2c0   : > { %v465_v56 = vadd.f32 1e-05, %v463_v55 }
 0x2c2   : > { %2748 = vrsqrt.f32 %v465_v56 }
 0x2cb   : > { %v2747_v57 = vpop.eup %2746 }
 0x2cc   : > { %v468_v58 = vmul.f32 %v2747_v57, %v452_v34  ;;  %v3277_v34 = vsub.s32 %v725_v24, %v3224_v5 }
 0x2ce   : > { %v476_v62 = vmul.f32 %v2476_v59, %v468_v58 }
 0x2cf   : > { %v2749_v60 = vpop.eup %2748 }
 0x2d0   : > { %v469_v61 = vmul.f32 %v2749_v60, %v453_v38  ;;  %v484_v1 = vadd.f32 %v2477_v63, %v476_v62 }
 0x2d2   : > { %v477_v0 = vmul.f32 %v2476_v59, %v469_v61 }
 0x2d4   : > { %v485_v2 = vadd.f32 %v2477_v63, %v477_v0 }
 0x2d6   : > { %v486_v3 = vpack.c.bf16 %v485_v2, %v484_v1 }
 0x2d8   : > { %2486 = vmatmul.mubr.msk.bf16.vlgmr.msra.gmra.mxu0 %vm398_vm0, %v486_v3 }
 0x2d9   : > { %2583 = vmatprep.mubr.msk.bf16.mxu0 %vm2979_vm1, %v2978_v14 }
 0x398   : > { %v584_v9 = vpop.f32.mrf.mxu0 }
 0x399   : > { %v3233_v10 = vadd.f32 %v584_v9, %v500_v8 }
 0x39a   : > { %v3235_v11 = vpop.f32.mrf.mxu0 }
 0x39b   : > { %619 = vrot.lane.b32.xlu1 %v3233_v10, %s2971_s26  ;;  %613 = vrot.lane.b32.xlu0 %v3233_v10, %s2972_s2 }
 0x39c   : > { %v588_v12 = vpop.f32.mrf.mxu0 }
 0x39d   : > { %v3241_v13 = vadd.f32 %v588_v12, %v500_v8 }
 0x39f   : > { %615 = vrot.lane.b32.xlu1 %v3241_v13, %s2972_s2  ;;  %625 = vrot.lane.b32.xlu0 %v3233_v10, %s2973_s25 }
 0x3a3   : > { %621 = vrot.lane.b32.xlu1 %v3241_v13, %s2971_s26  ;;  %631 = vrot.lane.b32.xlu0 %v3233_v10, %s2974_s7 }
 0x3a7   : > { %627 = vrot.lane.b32.xlu1 %v3241_v13, %s2973_s25  ;;  %595 = vrot.lane.b32.xlu0 %v3233_v10, %s2975_s24 }
 0x3ab   : > { %633 = vrot.lane.b32.xlu1 %v3241_v13, %s2974_s7  ;;  %601 = vrot.lane.b32.xlu0 %v3233_v10, %s2976_s21 }
 0x3af   : > { %597 = vrot.lane.b32.xlu1 %v3241_v13, %s2975_s24  ;;  %607 = vrot.lane.b32.xlu0 %v3233_v10, %s2977_s15 }
 0x3b3   : > { %603 = vrot.lane.b32.xlu1 %v3241_v13, %s2976_s21 }
 0x3b7   : > { %609 = vrot.lane.b32.xlu1 %v3241_v13, %s2977_s15 }
 0x40d   : > { %v620_v17 = vpop.permute.xlu1 %619  ;;  %v614_v18 = vpop.permute.xlu0 %613 }
 0x411   : > { %v616_v22 = vpop.permute.xlu1 %615  ;;  %v626_v23 = vpop.permute.xlu0 %625 }
 0x412   : > { %v689_v27 = vcombine.low %v614_v18, %v626_v23  ;;  %v690_v28 = vcombine.high %v614_v18, %v626_v23 }
 0x414   : > { %v697_v35 = vrot.slane %v689_v27, %v3274_v25  ;;  %v704_v36 = vrot.slane %v690_v28, %v3274_v25 }
 0x415   : > { %v622_v29 = vpop.permute.xlu1 %621  ;;  %v632_v31 = vpop.permute.xlu0 %631 }
 0x416   : > { %v705_v32 = vcombine.low %v620_v17, %v632_v31  ;;  %v706_v33 = vcombine.high %v620_v17, %v632_v31 }
 0x418   : > { %v713_v37 = vrot.slane %v705_v32, %v3274_v25  ;;  %v720_v38 = vrot.slane %v706_v33, %v3274_v25 }
 0x419   : > { %v628_v39 = vpop.permute.xlu1 %627  ;;  %v596_v40 = vpop.permute.xlu0 %595 }
 0x41a   : > { %v753_v41 = vcombine.low %v697_v35, %v713_v37  ;;  %v754_v42 = vcombine.high %v697_v35, %v713_v37  ;;  %v769_v43 = vcombine.low %v704_v36, %v720_v38  ;;  %v770_v44 = vcombine.high %v704_v36, %v720_v38 }
 0x41b   : > { %v893_v47 = vcombine.low %v616_v22, %v628_v39  ;;  %v894_v48 = vcombine.high %v616_v22, %v628_v39 }
 0x41c   : > { %v761_v45 = vrot.slane %v753_v41, %v3277_v34  ;;  %v768_v46 = vrot.slane %v754_v42, %v3277_v34  ;;  %v777_v49 = vrot.slane %v769_v43, %v3277_v34  ;;  %v784_v50 = vrot.slane %v770_v44, %v3277_v34 }
 0x41d   : > { %v634_v51 = vpop.permute.xlu1 %633  ;;  %v602_v52 = vpop.permute.xlu0 %601  ;;  %v901_v57 = vrot.slane %v893_v47, %v3274_v25  ;;  %v908_v58 = vrot.slane %v894_v48, %v3274_v25 }
 0x41e   : > { %v2488_v53 = vcombine.low %v761_v45, %v768_v46  ;;  %v2490_v54 = vcombine.high %v761_v45, %v768_v46  ;;  %v909_v55 = vcombine.low %v622_v29, %v634_v51  ;;  %v910_v56 = vcombine.high %v622_v29, %v634_v51 }
 0x41f   : > { %v657_v59 = vcombine.low %v3233_v10, %v602_v52  ;;  %v658_v60 = vcombine.high %v3233_v10, %v602_v52  ;;  %v2492_v61 = vcombine.low %v777_v49, %v784_v50  ;;  %v2494_v62 = vcombine.high %v777_v49, %v784_v50 }
 0x420   : > { %v917_v63 = vrot.slane %v909_v55, %v3274_v25  ;;  %v924_v0 = vrot.slane %v910_v56, %v3274_v25  ;;  %v3294_v6 = vrot.slane %v2488_v53, %v3274_v25  ;;  %v3297_v8 = vrot.slane %v2490_v54, %v3274_v25 }
 0x421   : > { %v598_v1 = vpop.permute.xlu1 %597  ;;  %v608_v2 = vpop.permute.xlu0 %607  ;;  %v665_v16 = vrot.slane %v657_v59, %v3274_v25  ;;  %v672_v17 = vrot.slane %v658_v60, %v3274_v25  ;;  %v3308_v35 = vrot.slane %v2492_v61, %v3274_v25  ;;  %v3311_v36 = vrot.slane %v2494_v62, %v3274_v25 }
 0x422   : > { %v673_v3 = vcombine.low %v596_v40, %v608_v2  ;;  %v674_v4 = vcombine.high %v596_v40, %v608_v2  ;;  %v957_v9 = vcombine.low %v901_v57, %v917_v63  ;;  %v958_v12 = vcombine.high %v901_v57, %v917_v63 }
 0x423   : > { %v973_v15 = vcombine.low %v908_v58, %v924_v0  ;;  %v974_v10 = vcombine.high %v908_v58, %v924_v0  ;;  %v1145_v52 = vcombine.low %v3294_v6, %v3297_v8  ;;  %v1177_v53 = vcombine.low %v3308_v35, %v3311_v36 }
 0x424   : > { %v681_v18 = vrot.slane %v673_v3, %v3274_v25  ;;  %v688_v19 = vrot.slane %v674_v4, %v3274_v25  ;;  %v965_v20 = vrot.slane %v957_v9, %v3277_v34  ;;  %v972_v21 = vrot.slane %v958_v12, %v3277_v34 }
 0x425   : > { %v981_v22 = vrot.slane %v973_v15, %v3277_v34  ;;  %v988_v23 = vrot.slane %v974_v10, %v3277_v34  ;;  %v604_v24 = vpop.permute.xlu1 %603  ;;  %v1153_v9 = vrot.slane %v1145_v52, %v3277_v34  ;;  %v1185_v12 = vrot.slane %v1177_v53, %v3277_v34 }
 0x426   : > { %v721_v27 = vcombine.low %v665_v16, %v681_v18  ;;  %v722_v28 = vcombine.high %v665_v16, %v681_v18  ;;  %v737_v29 = vcombine.low %v672_v17, %v688_v19  ;;  %v738_v31 = vcombine.high %v672_v17, %v688_v19 }
 0x427   : > { %v2496_v32 = vcombine.low %v965_v20, %v972_v21  ;;  %v2498_v33 = vcombine.high %v965_v20, %v972_v21  ;;  %v2500_v41 = vcombine.low %v981_v22, %v988_v23  ;;  %v2502_v42 = vcombine.high %v981_v22, %v988_v23 }
 0x428   : > { %v729_v37 = vrot.slane %v721_v27, %v3277_v34  ;;  %v736_v38 = vrot.slane %v722_v28, %v3277_v34  ;;  %v745_v39 = vrot.slane %v737_v29, %v3277_v34  ;;  %v752_v40 = vrot.slane %v738_v31, %v3277_v34 }
 0x429   : > { %v861_v43 = vcombine.low %v3241_v13, %v604_v24  ;;  %v862_v44 = vcombine.high %v3241_v13, %v604_v24  ;;  %v610_v45 = vpop.permute.xlu1 %609  ;;  %v1216_v56 = vrot.slane %v2496_v32, %v3274_v25  ;;  %v1232_v59 = vrot.slane %v2498_v33, %v3274_v25 }
 0x42a   : > { %v2487_v46 = vcombine.low %v729_v37, %v736_v38  ;;  %v2489_v47 = vcombine.high %v729_v37, %v736_v38  ;;  %v2491_v48 = vcombine.low %v745_v39, %v752_v40  ;;  %v2493_v49 = vcombine.high %v745_v39, %v752_v40 }
 0x42b   : > { %v877_v50 = vcombine.low %v598_v1, %v610_v45  ;;  %v878_v51 = vcombine.high %v598_v1, %v610_v45  ;;  %v869_v55 = vrot.slane %v861_v43, %v3274_v25  ;;  %v876_v13 = vrot.slane %v862_v44, %v3274_v25 }
 0x42c   : > { %v3324_v54 = vrot.slane %v2487_v46, %v3274_v25  ;;  %v1248_v60 = vrot.slane %v2500_v41, %v3274_v25  ;;  %v3334_v61 = vrot.slane %v2489_v47, %v3274_v25  ;;  %v3337_v62 = vrot.slane %v2491_v48, %v3274_v25 }
 0x42d   : > { %v885_v57 = vrot.slane %v877_v50, %v3274_v25  ;;  %v892_v58 = vrot.slane %v878_v51, %v3274_v25  ;;  %v3340_v63 = vrot.slane %v2493_v49, %v3274_v25  ;;  %v1264_v0 = vrot.slane %v2502_v42, %v3274_v25 }
 0x42e   : > { %v1281_v15 = vcombine.low %v1216_v56, %v1232_v59  ;;  %v1129_v22 = vcombine.low %v3324_v54, %v3334_v61  ;;  %v1197_v31 = vcombine.low %v1153_v9, %v1185_v12  ;;  %v1198_v49 = vcombine.high %v1153_v9, %v1185_v12 }
 0x42f   : > { %v925_v1 = vcombine.low %v869_v55, %v885_v57  ;;  %v926_v2 = vcombine.high %v869_v55, %v885_v57  ;;  %v941_v3 = vcombine.low %v876_v13, %v892_v58  ;;  %v942_v4 = vcombine.high %v876_v13, %v892_v58 }
 0x430   : > { %v1313_v10 = vcombine.low %v1248_v60, %v1264_v0  ;;  %v1289_v20 = vrot.slane %v1281_v15, %v3277_v34  ;;  %v1161_v23 = vcombine.low %v3337_v62, %v3340_v63  ;;  %v1137_v41 = vrot.slane %v1129_v22, %v3277_v34 }
 0x431   : > { %v933_v16 = vrot.slane %v925_v1, %v3277_v34  ;;  %v940_v17 = vrot.slane %v926_v2, %v3277_v34  ;;  %v949_v18 = vrot.slane %v941_v3, %v3277_v34  ;;  %v956_v19 = vrot.slane %v942_v4, %v3277_v34 }
 0x432   : > { %v1321_v21 = vrot.slane %v1313_v10, %v3277_v34  ;;  %v1169_v42 = vrot.slane %v1161_v23, %v3277_v34  ;;  %v1146_v50 = vcombine.high %v3294_v6, %v3297_v8  ;;  %v1178_v51 = vcombine.high %v3308_v35, %v3311_v36 }
 0x433   : > { %v2495_v24 = vcombine.low %v933_v16, %v940_v17  ;;  %v2497_v27 = vcombine.high %v933_v16, %v940_v17  ;;  %v2499_v28 = vcombine.low %v949_v18, %v956_v19  ;;  %v2501_v29 = vcombine.high %v949_v18, %v956_v19 }
 0x434   : > { %v1333_v32 = vcombine.low %v1289_v20, %v1321_v21  ;;  %v1334_v46 = vcombine.high %v1289_v20, %v1321_v21  ;;  %v1282_v52 = vcombine.high %v1216_v56, %v1232_v59  ;;  %v1314_v53 = vcombine.high %v1248_v60, %v1264_v0 }
 0x435   : > { %v1209_v33 = vrot.slane %v2495_v24, %v3274_v25  ;;  %v1225_v37 = vrot.slane %v2497_v27, %v3274_v25  ;;  %v1241_v38 = vrot.slane %v2499_v28, %v3274_v25  ;;  %v1257_v39 = vrot.slane %v2501_v29, %v3274_v25 }
 0x436   : > { %v1485_v40 = vpack.c.bf16 %v1333_v32, %v1197_v31  ;;  %v1193_v55 = vcombine.low %v1137_v41, %v1169_v42  ;;  %v1486_v57 = vpack.c.bf16 %v1334_v46, %v1198_v49  ;;  %v1296_v58 = vrot.slane %v1282_v52, %v3277_v34 }
 0x437   : > { %v1265_v43 = vcombine.low %v1209_v33, %v1225_v37  ;;  %v1297_v44 = vcombine.low %v1241_v38, %v1257_v39  ;;  %v1328_v1 = vrot.slane %v1314_v53, %v3277_v34  ;;  %v1160_v3 = vrot.slane %v1146_v50, %v3277_v34 }
 0x438   : > { %v1498_v45 = vsel %vm1493_vm2, %v1485_v40, 0  ;;  %v1192_v4 = vrot.slane %v1178_v51, %v3277_v34  ;;  %v1545_v6 = vsel %vm1493_vm2, %v1486_v57, 0  ;;  %v1266_v35 = vcombine.high %v1209_v33, %v1225_v37  ;;  %v590_v57 = vpop.f32.mrf.mxu0 }
 0x439   : > { %2558 = vmatpush3.bf16.xpose.msra.mxu1 %v1498_v45  ;;  %v1273_v47 = vrot.slane %v1265_v43, %v3277_v34  ;;  %v1305_v48 = vrot.slane %v1297_v44, %v3277_v34  ;;  %v1335_v8 = vcombine.low %v1296_v58, %v1328_v1  ;;  %v1298_v36 = vcombine.high %v1241_v38, %v1257_v39 }
 0x43a   : > { %2563 = vmatprep.subr.bf16.mxu1 %v2978_v14  ;;  %v1199_v59 = vcombine.low %v1160_v3, %v1192_v4  ;;  %v1130_v60 = vcombine.high %v3324_v54, %v3334_v61  ;;  %v1162_v0 = vcombine.high %v3337_v62, %v3340_v63  ;;  %v1194_v9 = vcombine.high %v1137_v41, %v1169_v42 }
 0x43b   : > { %v1329_v13 = vcombine.low %v1273_v47, %v1305_v48  ;;  %v1330_v56 = vcombine.high %v1273_v47, %v1305_v48  ;;  %v1280_v15 = vrot.slane %v1266_v35, %v3277_v34  ;;  %v1312_v10 = vrot.slane %v1298_v36, %v3277_v34 }
 0x43c   : > { %v1487_v12 = vpack.c.bf16 %v1335_v8, %v1199_v59  ;;  %v1144_v17 = vrot.slane %v1130_v60, %v3277_v34  ;;  %v1176_v18 = vrot.slane %v1162_v0, %v3277_v34  ;;  %v1336_v20 = vcombine.high %v1296_v58, %v1328_v1 }
 0x43d   : > { %v1481_v2 = vpack.c.bf16 %v1329_v13, %v1193_v55  ;;  %v1482_v16 = vpack.c.bf16 %v1330_v56, %v1194_v9  ;;  %v1331_v54 = vcombine.low %v1280_v15, %v1312_v10  ;;  %v1200_v61 = vcombine.high %v1160_v3, %v1192_v4 }
 0x43e   : > { %v1592_v19 = vsel %vm1493_vm2, %v1487_v12, 0  ;;  %v1195_v62 = vcombine.low %v1144_v17, %v1176_v18  ;;  %v1332_v23 = vcombine.high %v1280_v15, %v1312_v10  ;;  %v1196_v24 = vcombine.high %v1144_v17, %v1176_v18 }
 0x43f   : > { %v1488_v63 = vpack.c.bf16 %v1336_v20, %v1200_v61  ;;  %v503_v13 = vsub.s32 1, %v3224_v5 }
 0x440   : > { %2560 = vmatmul.mubr.msk.bf16.vlgmr.msra.gmra.mxu1 %vm1493_vm2, %v1481_v2  ;;  %v1483_v21 = vpack.c.bf16 %v1331_v54, %v1195_v62  ;;  %v1484_v27 = vpack.c.bf16 %v1332_v23, %v1196_v24 }
 0x441   : > { %2564 = vmatpush3.bf16.xpose.msra.mxu1 %v1545_v6  ;;  %2565 = vmatprep.mubr.msk.bf16.mxu1 %vm2979_vm1, %v2978_v14  ;;  %v1639_v22 = vsel %vm1493_vm2, %v1488_v63, 0  ;;  %v504_v58 = vrot.slane %v3230_v7, %v503_v13 }
 0x442   : > { %2569 = vmatprep.subr.bf16.mxu1 %v2978_v14 }
 0x443   : > { %v3413_v1 = vadd.f32 %v590_v57, %v504_v58  ;;  %v3418_v2 = vadd.f32 %v3235_v11, %v504_v58 }
 0x448   : > { %2566 = vmatmul.mubr.msk.bf16.vlgmr.msra.gmra.mxu1 %vm1493_vm2, %v1482_v16 }
 0x449   : > { %2570 = vmatpush3.bf16.xpose.msra.mxu1 %v1592_v19  ;;  %2571 = vmatprep.mubr.msk.bf16.mxu1 %vm2979_vm1, %v2978_v14 }
 0x44a   : > { %2575 = vmatprep.subr.bf16.mxu1 %v2978_v14 }
 0x450   : > { %2572 = vmatmul.mubr.msk.bf16.vlgmr.msra.gmra.mxu1 %vm1493_vm2, %v1483_v21 }
 0x451   : > { %2576 = vmatpush3.bf16.xpose.msra.mxu1 %v1639_v22  ;;  %2577 = vmatprep.mubr.msk.bf16.mxu1 %vm2979_vm1, %v2978_v14 }
 0x452   : > { %2587 = vmatprep.subr.bf16.mxu1 %v2978_v14 }
 0x458   : > { %2578 = vmatmul.mubr.msk.bf16.vlgmr.msra.gmra.mxu1 %vm1493_vm2, %v1484_v27 }
 0x459   : > { %2589 = vmatprep.mubr.msk.bf16.mxu1 %vm2979_vm1, %v2978_v14 }
 0x500   : > { %v1534_v28 = vpop.f32.mrf.mxu1 }
 0x501   : > { %v1682_v29 = vsel %vm1493_vm2, %v1534_v28, -inf }
 0x502   : > { %1683 = vmax.xlane.f32.xlu0 %v1682_v29  ;;  %v2561_v31 = vpop.f32.mrf.mxu1 }
 0x504   : > { %v1537_v32 = vpop.f32.mrf.mxu1 }
 0x505   : > { %v1685_v33 = vsel %vm1493_vm2, %v1537_v32, -inf }
 0x506   : > { %1686 = vmax.xlane.f32.xlu1 %v1685_v33  ;;  %v2562_v37 = vpop.f32.mrf.mxu1 }
 0x508   : > { %v1581_v38 = vpop.f32.mrf.mxu1 }
 0x509   : > { %v1688_v39 = vsel %vm1493_vm2, %v1581_v38, -inf }
 0x50a   : > { %1689 = vmax.xlane.f32.xlu0 %v1688_v39  ;;  %v2567_v40 = vpop.f32.mrf.mxu1 }
 0x50c   : > { %v1584_v41 = vpop.f32.mrf.mxu1 }
 0x50d   : > { %v1691_v42 = vsel %vm1493_vm2, %v1584_v41, -inf }
 0x50e   : > { %1692 = vmax.xlane.f32.xlu0 %v1691_v42  ;;  %v2568_v43 = vpop.f32.mrf.mxu1 }
 0x510   : > { %v1628_v44 = vpop.f32.mrf.mxu1 }
 0x511   : > { %v1694_v45 = vsel %vm1493_vm2, %v1628_v44, -inf }
 0x512   : > { %1695 = vmax.xlane.f32.xlu0 %v1694_v45  ;;  %v2573_v46 = vpop.f32.mrf.mxu1 }
 0x514   : > { %v3404_v47 = vpop.f32.mrf.mxu1 }
 0x515   : > { %v1697_v48 = vsel %vm1493_vm2, %v3404_v47, -inf }
 0x516   : > { %1698 = vmax.xlane.f32.xlu1 %v1697_v48  ;;  %v2574_v49 = vpop.f32.mrf.mxu1 }
 0x518   : > { %v1675_v50 = vpop.f32.mrf.mxu1 }
 0x519   : > { %v1700_v51 = vsel %vm1493_vm2, %v1675_v50, -inf }
 0x51a   : > { %1701 = vmax.xlane.f32.xlu0 %v1700_v51  ;;  %v2579_v52 = vpop.f32.mrf.mxu1 }
 0x51c   : > { %v3409_v53 = vpop.f32.mrf.mxu1 }
 0x51d   : > { %v1703_v5 = vsel %vm1493_vm2, %v3409_v53, -inf }
 0x51e   : > { %v2580_v55 = vpop.f32.mrf.mxu1 }
 0x527   : > { %641 = vrot.lane.b32.xlu1 %v3413_v1, %s2975_s24 }
 0x52b   : > { %645 = vrot.lane.b32.xlu1 %v3418_v2, %s2976_s21 }
 0x530   : > { %639 = vrot.lane.b32.xlu0 %v3418_v2, %s2975_s24  ;;  %s2982_s24 = smov [#allocation10]  }
 0x534   : > { %651 = vrot.lane.b32.xlu0 %v3418_v2, %s2977_s15 }
 0x54f   : > { %1704 = vmax.xlane.f32.xlu1 %v1703_v5 }
 0x560   : > { %647 = vrot.lane.b32.xlu1 %v3413_v1, %s2976_s21  ;;  %s2892_s21 = sshll.u32 %s2982_s24, 4  ;;  %s2893_s21 = int_to_ptr.vmem [resolvable:$false] %s2892_s21 }
 0x561   : > { %p2895_p10 = scmp.lt.s32.totalorder %s3576_s29, %s2893_s21 }
 0x58b   : > { %v1684_v7 = vpop.xlane.xlu0 %1683 }
 0x58c   : > { %v1706_v3 = vsub.f32 %v1534_v28, %v1684_v7 }
 0x58e   : > { %v1714_v11 = vmul.f32 1.442695, %v1706_v3 }
 0x58f   : > { %v1687_v4 = vpop.xlane.xlu1 %1686 }
 0x590   : > { %2750 = vpow2.f32 %v1714_v11  ;;  %v1707_v6 = vsub.f32 %v1537_v32, %v1687_v4 }
 0x592   : > { %v1716_v8 = vmul.f32 1.442695, %v1707_v6 }
 0x593   : > { %v1690_v35 = vpop.xlane.xlu0 %1689 }
 0x594   : > { %2752 = vpow2.f32 %v1716_v8  ;;  %v1708_v36 = vsub.f32 %v1581_v38, %v1690_v35 }
 0x596   : > { %v1718_v56 = vmul.f32 1.442695, %v1708_v36 }
 0x597   : > { %v1693_v59 = vpop.xlane.xlu0 %1692 }
 0x598   : > { %2754 = vpow2.f32 %v1718_v56  ;;  %v1709_v60 = vsub.f32 %v1584_v41, %v1693_v59 }
 0x59a   : > { %v1720_v0 = vmul.f32 1.442695, %v1709_v60 }
 0x59b   : > { %v1696_v9 = vpop.xlane.xlu0 %1695 }
 0x59c   : > { %2756 = vpow2.f32 %v1720_v0  ;;  %v1710_v12 = vsub.f32 %v1628_v44, %v1696_v9 }
 0x59d   : > { %v3430_v15 = vpop.eup %2750 }
 0x59e   : > { %v1722_v10 = vmul.f32 1.442695, %v1710_v12  ;;  %v1730_v16 = vsel %vm1493_vm2, %v3430_v15, 0.0 }
 0x59f   : > { %1731 = vadd.xlane.f32.xlu0 %v1730_v16  ;;  %v1699_v28 = vpop.xlane.xlu1 %1698 }
 0x5a0   : > { %2758 = vpow2.f32 %v1722_v10  ;;  %v1711_v29 = vsub.f32 %v3404_v47, %v1699_v28 }
 0x5a1   : > { %v3434_v17 = vpop.eup %2752 }
 0x5a2   : > { %v1733_v18 = vsel %vm1493_vm2, %v3434_v17, 0.0  ;;  %v1724_v31 = vmul.f32 1.442695, %v1711_v29 }
 0x5a3   : > { %v1702_v19 = vpop.xlane.xlu0 %1701  ;;  %1734 = vadd.xlane.f32.xlu1 %v1733_v18  ;;  %v642_v32 = vpop.permute.xlu1 %641 }
 0x5a4   : > { %v1712_v20 = vsub.f32 %v1675_v50, %v1702_v19 }
 0x5a5   : > { %v3438_v54 = vpop.eup %2754 }
 0x5a6   : > { %v1726_v61 = vmul.f32 1.442695, %v1712_v20  ;;  %v1736_v62 = vsel %vm1493_vm2, %v3438_v54, 0.0 }
 0x5a7   : > { %1737 = vadd.xlane.f32.xlu0 %v1736_v62  ;;  %v646_v33 = vpop.permute.xlu1 %645  ;;  %v640_v44 = vpop.permute.xlu0 %639 }
 0x5a8   : > { %2760 = vpow2.f32 %v1726_v61  ;;  %v793_v47 = vcombine.low %v3418_v2, %v646_v33  ;;  %v794_v49 = vcombine.high %v3418_v2, %v646_v33 }
 0x5a9   : > { %v3442_v63 = vpop.eup %2756  ;;  %2762 = vpow2.f32 %v1724_v31 }
 0x5aa   : > { %v1739_v21 = vsel %vm1493_vm2, %v3442_v63, 0.0  ;;  %v801_v51 = vrot.slane %v793_v47, %v3274_v25  ;;  %v808_v55 = vrot.slane %v794_v49, %v3274_v25 }
 0x5ab   : > { %1740 = vadd.xlane.f32.xlu1 %v1739_v21  ;;  %v652_v45 = vpop.permute.xlu0 %651 }
 0x5ac   : > { %v809_v46 = vcombine.low %v640_v44, %v652_v45  ;;  %v810_v48 = vcombine.high %v640_v44, %v652_v45 }
 0x5ad   : > { %v3446_v22 = vpop.eup %2758 }
 0x5ae   : > { %v1742_v23 = vsel %vm1493_vm2, %v3446_v22, 0.0  ;;  %v817_v50 = vrot.slane %v809_v46, %v3274_v25  ;;  %v824_v52 = vrot.slane %v810_v48, %v3274_v25 }
 0x5af   : > { %1743 = vadd.xlane.f32.xlu0 %v1742_v23 }
 0x5b0   : > { %v825_v13 = vcombine.low %v801_v51, %v817_v50  ;;  %v826_v57 = vcombine.high %v801_v51, %v817_v50  ;;  %v841_v58 = vcombine.low %v808_v55, %v824_v52  ;;  %v842_v5 = vcombine.high %v808_v55, %v824_v52 }
 0x5b2   : > { %v833_v3 = vrot.slane %v825_v13, %v3277_v34  ;;  %v840_v11 = vrot.slane %v826_v57, %v3277_v34  ;;  %v849_v2 = vrot.slane %v841_v58, %v3277_v34  ;;  %v856_v4 = vrot.slane %v842_v5, %v3277_v34 }
 0x5b4   : > { %v1337_v35 = vcombine.low %v833_v3, %v840_v11  ;;  %v2503_v59 = vcombine.high %v833_v3, %v840_v11  ;;  %v1353_v60 = vcombine.low %v849_v2, %v856_v4  ;;  %v2504_v0 = vcombine.high %v849_v2, %v856_v4 }
 0x5b5   : > { %v3450_v24 = vpop.eup %2760 }
 0x5b6   : > { %v1748_v27 = vsel %vm1493_vm2, %v3450_v24, 0.0  ;;  %v3458_v40 = vpop.eup %2762  ;;  %v1344_v18 = vrot.slane %v1337_v35, %v3274_v25  ;;  %v1352_v62 = vrot.slane %v2503_v59, %v3274_v25  ;;  %v1360_v21 = vrot.slane %v1353_v60, %v3274_v25 }
 0x5b7   : > { %1749 = vadd.xlane.f32.xlu0 %v1748_v27  ;;  %v1745_v41 = vsel %vm1493_vm2, %v3458_v40, 0.0  ;;  %v1368_v23 = vrot.slane %v2504_v0, %v3274_v25 }
 0x5b9   : > { %v1386_v55 = vcombine.high %v1360_v21, %v1368_v23 }
 0x5bc   : > { %653 = vrot.lane.b32.xlu1 %v3413_v1, %s2977_s15  ;;  %s2894_s15 = scalar_lea.vmem %s2893_s21, 256 }
 0x5bd   : > { %p2896_p13 = scmp.lt.s32.totalorder %s2894_s15, %s2888_s13 }
 0x5bf   : > { %p2897_p2 = por %p2896_p13, %p2895_p10 }
 0x5c1   : > { %p2898_p3 = pnand %p2897_p2, %p2891_p1 }
 0x5d8   : > { %v1705_v37 = vpop.xlane.xlu1 %1704 }
 0x5d9   : > { %v1713_v38 = vsub.f32 %v3409_v53, %v1705_v37 }
 0x5db   : > { %v1728_v39 = vmul.f32 1.442695, %v1713_v38 }
 0x5dc   : > { %v648_v53 = vpop.permute.xlu1 %647 }
 0x5dd   : > { %2764 = vpow2.f32 %v1728_v39  ;;  %v997_v36 = vcombine.low %v3413_v1, %v648_v53  ;;  %v998_v56 = vcombine.high %v3413_v1, %v648_v53  ;;  %v1369_v39 = vcombine.low %v1344_v18, %v1352_v62 }
 0x5de   : > { %v1370_v53 = vcombine.high %v1344_v18, %v1352_v62 }
 0x5df   : > { %v1005_v19 = vrot.slane %v997_v36, %v3274_v25  ;;  %v1012_v20 = vrot.slane %v998_v56, %v3274_v25  ;;  %v1377_v51 = vrot.slane %v1369_v39, %v3277_v34  ;;  %v1400_v36 = vrot.slane %v1386_v55, %v3277_v34 }
 0x5e0   : > { %1746 = vadd.xlane.f32.xlu1 %v1745_v41  ;;  %v1385_v41 = vcombine.low %v1360_v21, %v1368_v23  ;;  %v1384_v35 = vrot.slane %v1370_v53, %v3277_v34 }
 0x5e2   : > { %v1393_v52 = vrot.slane %v1385_v41, %v3277_v34  ;;  %v1403_v62 = vcombine.low %v1384_v35, %v1400_v36  ;;  %v1404_v21 = vcombine.high %v1384_v35, %v1400_v36 }
 0x5e4   : > { %v1401_v59 = vcombine.low %v1377_v51, %v1393_v52  ;;  %v1402_v0 = vcombine.high %v1377_v51, %v1393_v52 }
 0x5ea   : > { %v3462_v42 = vpop.eup %2764 }
 0x5eb   : > { %v1751_v43 = vsel %vm1493_vm2, %v3462_v42, 0.0 }
 0x5ec   : > { %1752 = vadd.xlane.f32.xlu0 %v1751_v43 }
 0x628   : > { %v1732_v8 = vpop.xlane.xlu0 %1731 }
 0x62c   : > { %v1735_v7 = vpop.xlane.xlu1 %1734 }
 0x62d   : > { %2766 = vrcp.f32 %v1735_v7 }
 0x630   : > { %v1738_v12 = vpop.xlane.xlu0 %1737 }
 0x634   : > { %v1741_v6 = vpop.xlane.xlu1 %1740 }
 0x635   : > { %2768 = vrcp.f32 %v1741_v6 }
 0x636   : > { %2770 = vrcp.f32 %v1732_v8 }
 0x637   : > { %2772 = vrcp.f32 %v1738_v12 }
 0x638   : > { %v654_v9 = vpop.permute.xlu1 %653 }
 0x639   : > { %v1013_v10 = vcombine.low %v642_v32, %v654_v9  ;;  %v1014_v16 = vcombine.high %v642_v32, %v654_v9 }
 0x63a   : > { %v2767_v7 = vpop.eup %2766 }
 0x63b   : > { %v1021_v61 = vrot.slane %v1013_v10, %v3274_v25  ;;  %v1028_v1 = vrot.slane %v1014_v16, %v3274_v25  ;;  %v1763_v12 = vmul.f32 %v2767_v7, %v3434_v17 }
 0x63d   : > { %v1029_v27 = vcombine.low %v1005_v19, %v1021_v61  ;;  %v1030_v28 = vcombine.high %v1005_v19, %v1021_v61  ;;  %v1045_v29 = vcombine.low %v1012_v20, %v1028_v1  ;;  %v1046_v31 = vcombine.high %v1012_v20, %v1028_v1 }
 0x63f   : > { %v1037_v32 = vrot.slane %v1029_v27, %v3277_v34  ;;  %v1044_v33 = vrot.slane %v1030_v28, %v3277_v34  ;;  %v1053_v37 = vrot.slane %v1045_v29, %v3277_v34  ;;  %v1060_v38 = vrot.slane %v1046_v31, %v3277_v34 }
 0x641   : > { %v1405_v43 = vcombine.low %v1037_v32, %v1044_v33  ;;  %v2505_v44 = vcombine.high %v1037_v32, %v1044_v33  ;;  %v1421_v45 = vcombine.low %v1053_v37, %v1060_v38  ;;  %v2506_v46 = vcombine.high %v1053_v37, %v1060_v38 }
 0x642   : > { %v2769_v3 = vpop.eup %2768 }
 0x643   : > { %v1412_v47 = vrot.slane %v1405_v43, %v3274_v25  ;;  %v1420_v48 = vrot.slane %v2505_v44, %v3274_v25  ;;  %v1428_v49 = vrot.slane %v1421_v45, %v3274_v25  ;;  %v1436_v50 = vrot.slane %v2506_v46, %v3274_v25  ;;  %v2771_v8 = vpop.eup %2770  ;;  %v2738_v46 = vld [vmem:[#allocation8 + $0x18] sm:$0xff]  }
 0x644   : > { %v2773_v56 = vpop.eup %2772  ;;  %v1765_v10 = vmul.f32 %v2769_v3, %v3442_v63  ;;  %v1762_v61 = vmul.f32 %v2771_v8, %v3430_v15  ;;  %v1744_v15 = vpop.xlane.xlu0 %1743 }
 0x645   : > { %v1437_v13 = vcombine.low %v1412_v47, %v1420_v48  ;;  %v1453_v57 = vcombine.low %v1428_v49, %v1436_v50  ;;  %v1438_v58 = vcombine.high %v1412_v47, %v1420_v48  ;;  %v1454_v5 = vcombine.high %v1428_v49, %v1436_v50 }
 0x646   : > { %v1764_v1 = vmul.f32 %v2773_v56, %v3438_v54  ;;  %v1770_v23 = vpack.c.bf16 %v1763_v12, %v1762_v61  ;;  %2774 = vrcp.f32 %v1744_v15 }
 0x647   : > { %v1445_v11 = vrot.slane %v1437_v13, %v3277_v34  ;;  %v1461_v2 = vrot.slane %v1453_v57, %v3277_v34  ;;  %v1452_v4 = vrot.slane %v1438_v58, %v3277_v34  ;;  %v1468_v6 = vrot.slane %v1454_v5, %v3277_v34 }
 0x648   : > { %v1771_v27 = vpack.c.bf16 %v1765_v10, %v1764_v1  ;;  %v1750_v28 = vpop.xlane.xlu0 %1749 }
 0x649   : > { %v1469_v60 = vcombine.low %v1445_v11, %v1461_v2  ;;  %v1470_v9 = vcombine.high %v1445_v11, %v1461_v2  ;;  %v1471_v19 = vcombine.low %v1452_v4, %v1468_v6  ;;  %v1472_v20 = vcombine.high %v1452_v4, %v1468_v6 }
 0x64b   : > { %v1489_v16 = vpack.c.bf16 %v1469_v60, %v1401_v59  ;;  %v1490_v18 = vpack.c.bf16 %v1470_v9, %v1402_v0  ;;  %v1491_v17 = vpack.c.bf16 %v1471_v19, %v1403_v62  ;;  %v1492_v63 = vpack.c.bf16 %v1472_v20, %v1404_v21 }
 0x64d   : > { %2582 = vmatpush3.bf16.msra.mxu0 %v1489_v16  ;;  %2588 = vmatpush3.bf16.msra.mxu1 %v1490_v18 }
 0x64e   : > { %2593 = vmatprep.subr.bf16.mxu0 %v2978_v14  ;;  %2599 = vmatprep.subr.bf16.mxu1 %v2978_v14 }
 0x650   : > { %2584 = vmatmul.mubr.msk.bf16.vlgmr.msra.gmra.mxu0 %vm1493_vm2, %v1770_v23  ;;  %2590 = vmatmul.mubr.msk.bf16.vlgmr.msra.gmra.mxu1 %vm1493_vm2, %v1771_v27 }
 0x651   : > { %2594 = vmatpush3.bf16.msra.mxu0 %v1491_v17  ;;  %2600 = vmatpush3.bf16.msra.mxu1 %v1492_v63 }
 0x652   : > { %2595 = vmatprep.mubr.msk.bf16.mxu0 %vm2979_vm1, %v2978_v14  ;;  %2601 = vmatprep.mubr.msk.bf16.mxu1 %vm2979_vm1, %v2978_v14 }
 0x653   : > { %2605 = vmatprep.subr.bf16.mxu0 %v2978_v14  ;;  %v2775_v29 = vpop.eup %2774 }
 0x654   : > { %v1766_v33 = vmul.f32 %v2775_v29, %v3446_v22  ;;  %v2739_v22 = vld [vmem:[#allocation8 + $0x10] sm:$0xff]  }
 0x669   : > { %v1747_v54 = vpop.xlane.xlu1 %1746 }
 0x66a   : > { %2776 = vrcp.f32 %v1747_v54 }
 0x66b   : > { %2778 = vrcp.f32 %v1750_v28 }
 0x675   : > { %v1753_v31 = vpop.xlane.xlu0 %1752 }
 0x676   : > { %2780 = vrcp.f32 %v1753_v31 }
 0x677   : > { %v2777_v32 = vpop.eup %2776 }
 0x678   : > { %v1767_v37 = vmul.f32 %v2777_v32, %v3458_v40  ;;  %v2779_v39 = vpop.eup %2778 }
 0x679   : > { %v1768_v43 = vmul.f32 %v2779_v39, %v3450_v24 }
 0x67a   : > { %v1772_v38 = vpack.c.bf16 %v1767_v37, %v1766_v33 }
 0x67c   : > { %2596 = vmatmul.mubr.msk.bf16.vlgmr.msra.gmra.mxu0 %vm1493_vm2, %v1772_v38 }
 0x67d   : > { %2613 = vmatprep.mubr.msk.bf16.mxu0 %vm2979_vm1, %v2978_v14  ;;  %2606 = vmatpush3.bf16.msra.mxu0 %v2738_v46 }
 0x67e   : > { %2607 = vmatprep.subr.bf16.mxu0 %v2978_v14 }
 0x681   : > { %2608 = vmatpush3.bf16.msra.mxu0 %v2739_v22 }
 0x682   : > { %2609 = vmatprep.subr.bf16.mxu0 %v2978_v14 }
 0x683   : > { %v2781_v41 = vpop.eup %2780 }
 0x684   : > { %v1769_v44 = vmul.f32 %v2781_v41, %v3462_v42 }
 0x686   : > { %v1773_v45 = vpack.c.bf16 %v1769_v44, %v1768_v43 }
 0x688   : > { %2602 = vmatmul.mubr.msk.bf16.vlgmr.msra.gmra.mxu1 %vm1493_vm2, %v1773_v45 }
 0x710   : > { %v1811_v40 = vpop.f32.mrf.mxu0  ;;  %v1855_v47 = vpop.f32.mrf.mxu1 }
 0x712   : > { %v2585_v48 = vpop.f32.mrf.mxu0  ;;  %v2591_v49 = vpop.f32.mrf.mxu1 }
 0x714   : > { %v1814_v50 = vpop.f32.mrf.mxu0  ;;  %v1858_v51 = vpop.f32.mrf.mxu1 }
 0x716   : > { %v2586_v24 = vpop.f32.mrf.mxu0  ;;  %v2592_v52 = vpop.f32.mrf.mxu1 }
 0x717   : > { %v2740_v52 = vld [vmem:[#allocation8 + $0x8] sm:$0xff]  }
 0x718   : > { %2610 = vmatpush3.bf16.msra.mxu0 %v2740_v52 }
 0x719   : > { %2611 = vmatprep.subr.bf16.mxu0 %v2978_v14 }
 0x73c   : > { %v1899_v42 = vpop.f32.mrf.mxu0 }
 0x73d   : > { %v1950_v57 = vcombine.low %v1811_v40, %v1899_v42  ;;  %v1951_v58 = vcombine.high %v1811_v40, %v1899_v42 }
 0x73e   : > { %v2597_v53 = vpop.f32.mrf.mxu0 }
 0x73f   : > { %v1958_v2 = vrot.slane %v1950_v57, %v3274_v25  ;;  %v1965_v4 = vrot.slane %v1951_v58, %v3274_v25 }
 0x740   : > { %v1902_v55 = vpop.f32.mrf.mxu0 }
 0x741   : > { %v2018_v35 = vcombine.low %v1814_v50, %v1902_v55  ;;  %v2019_v36 = vcombine.high %v1814_v50, %v1902_v55 }
 0x742   : > { %v2598_v13 = vpop.f32.mrf.mxu0 }
 0x743   : > { %v2026_v1 = vrot.slane %v2018_v35, %v3274_v25  ;;  %v2033_v62 = vrot.slane %v2019_v36, %v3274_v25  ;;  %v2741_v35 = vld [vmem:[#allocation8] sm:$0xff]  }
 0x744   : > { %2612 = vmatpush3.bf16.msra.mxu0 %v2741_v35 }
 0x748   : > { %v1943_v5 = vpop.f32.mrf.mxu1 }
 0x749   : > { %v1966_v7 = vcombine.low %v1855_v47, %v1943_v5  ;;  %v1967_v3 = vcombine.high %v1855_v47, %v1943_v5 }
 0x74a   : > { %v2603_v11 = vpop.f32.mrf.mxu1 }
 0x74b   : > { %v1974_v6 = vrot.slane %v1966_v7, %v3274_v25  ;;  %v1981_v8 = vrot.slane %v1967_v3, %v3274_v25 }
 0x74c   : > { %v1946_v56 = vpop.f32.mrf.mxu1 }
 0x74d   : > { %v1982_v59 = vcombine.low %v1958_v2, %v1974_v6  ;;  %v1983_v60 = vcombine.high %v1958_v2, %v1974_v6  ;;  %v1998_v0 = vcombine.low %v1965_v4, %v1981_v8  ;;  %v1999_v9 = vcombine.high %v1965_v4, %v1981_v8 }
 0x74e   : > { %v2034_v12 = vcombine.low %v1858_v51, %v1946_v56  ;;  %v2035_v10 = vcombine.high %v1858_v51, %v1946_v56  ;;  %v2604_v16 = vpop.f32.mrf.mxu1 }
 0x74f   : > { %v1990_v18 = vrot.slane %v1982_v59, %v3277_v34  ;;  %v1997_v19 = vrot.slane %v1983_v60, %v3277_v34  ;;  %v2006_v20 = vrot.slane %v1998_v0, %v3277_v34  ;;  %v2013_v61 = vrot.slane %v1999_v9, %v3277_v34 }
 0x750   : > { %v2042_v21 = vrot.slane %v2034_v12, %v3274_v25  ;;  %v2049_v23 = vrot.slane %v2035_v10, %v3274_v25 }
 0x751   : > { %v2086_v27 = vcombine.low %v1990_v18, %v1997_v19  ;;  %v2515_v17 = vcombine.high %v1990_v18, %v1997_v19  ;;  %v2102_v63 = vcombine.low %v2006_v20, %v2013_v61  ;;  %v2516_v15 = vcombine.high %v2006_v20, %v2013_v61 }
 0x752   : > { %v2050_v54 = vcombine.low %v2026_v1, %v2042_v21  ;;  %v2051_v28 = vcombine.high %v2026_v1, %v2042_v21  ;;  %v2066_v29 = vcombine.low %v2033_v62, %v2049_v23  ;;  %v2067_v31 = vcombine.high %v2033_v62, %v2049_v23 }
 0x753   : > { %v2093_v32 = vrot.slane %v2086_v27, %v3274_v25  ;;  %v2101_v33 = vrot.slane %v2515_v17, %v3274_v25  ;;  %v2109_v37 = vrot.slane %v2102_v63, %v3274_v25  ;;  %v2117_v38 = vrot.slane %v2516_v15, %v3274_v25 }
 0x754   : > { %v2058_v39 = vrot.slane %v2050_v54, %v3277_v34  ;;  %v2065_v41 = vrot.slane %v2051_v28, %v3277_v34  ;;  %v2074_v43 = vrot.slane %v2066_v29, %v3277_v34  ;;  %v2081_v44 = vrot.slane %v2067_v31, %v3277_v34  ;;  %v2519_v31 = vld [vmem:[%s3629_s8] ss:$0 sm:$0xff] }
 0x755   : > { %v2119_v45 = vcombine.high %v2093_v32, %v2101_v33  ;;  %v2135_v46 = vcombine.high %v2109_v37, %v2117_v38  ;;  %v2118_v22 = vcombine.low %v2093_v32, %v2101_v33  ;;  %v2134_v40 = vcombine.low %v2109_v37, %v2117_v38 }
 0x756   : > { %v2154_v47 = vcombine.low %v2058_v39, %v2065_v41  ;;  %v2517_v48 = vcombine.high %v2058_v39, %v2065_v41  ;;  %v2170_v49 = vcombine.low %v2074_v43, %v2081_v44  ;;  %v2518_v50 = vcombine.high %v2074_v43, %v2081_v44 }
 0x757   : > { %v2126_v51 = vrot.slane %v2118_v22, %v3277_v34  ;;  %v2142_v24 = vrot.slane %v2134_v40, %v3277_v34  ;;  %v2133_v57 = vrot.slane %v2119_v45, %v3277_v34  ;;  %v2149_v58 = vrot.slane %v2135_v46, %v3277_v34 }
 0x758   : > { %v2161_v42 = vrot.slane %v2154_v47, %v3274_v25  ;;  %v2169_v53 = vrot.slane %v2517_v48, %v3274_v25  ;;  %v2177_v55 = vrot.slane %v2170_v49, %v3274_v25  ;;  %v2185_v13 = vrot.slane %v2518_v50, %v3274_v25 }
 0x759   : > { %v2150_v5 = vcombine.low %v2126_v51, %v2142_v24  ;;  %v2152_v36 = vcombine.low %v2133_v57, %v2149_v58  ;;  %v2151_v59 = vcombine.high %v2126_v51, %v2142_v24  ;;  %v2153_v14 = vcombine.high %v2133_v57, %v2149_v58 }
 0x75a   : > { %v2187_v7 = vcombine.high %v2161_v42, %v2169_v53  ;;  %v2203_v3 = vcombine.high %v2177_v55, %v2185_v13  ;;  %v2186_v11 = vcombine.low %v2161_v42, %v2169_v53  ;;  %v2202_v2 = vcombine.low %v2177_v55, %v2185_v13 }
 0x75c   : > { %v2201_v4 = vrot.slane %v2187_v7, %v3277_v34  ;;  %v2217_v6 = vrot.slane %v2203_v3, %v3277_v34  ;;  %v2194_v8 = vrot.slane %v2186_v11, %v3277_v34  ;;  %v2210_v25 = vrot.slane %v2202_v2, %v3277_v34 }
 0x75e   : > { %v2220_v56 = vcombine.low %v2201_v4, %v2217_v6  ;;  %v2219_v60 = vcombine.high %v2194_v8, %v2210_v25  ;;  %v2218_v0 = vcombine.low %v2194_v8, %v2210_v25  ;;  %v2221_v10 = vcombine.high %v2201_v4, %v2217_v6 }
 0x760   : > { %v2716_v9 = vpack.i.bf16 %v2220_v56, %v2152_v36  ;;  %v2711_v12 = vpack.i.bf16 %v2219_v60, %v2151_v59  ;;  %v2721_v16 = vpack.i.bf16 %v2221_v10, %v2153_v14 }
 0x762   : > { %2717 = vrot.lane.b32.xlu1 %v2716_v9, %s2973_s25  ;;  %2712 = vrot.lane.b32.xlu0 %v2711_v12, %s2974_s7  ;;  %s3574_s25 = scalar_lea.hbm %s3630_s9, %s2535_s27  ;;  %s2344_s7 = scalar_lea.sflag [#allocation4], %s3182_s5 }
 0x766   : > { %2722 = vrot.lane.b32.xlu1 %v2721_v16, %s2971_s26 }
 0x7d4   : > { %v2718_v18 = vpop.permute.xlu1 %2717  ;;  %v2713_v34 = vpop.permute.xlu0 %2712 }
 0x7d5   : > { %v2715_v19 = vunpack.i.h.bf16 %v2713_v34  ;;  %v2714_v20 = vunpack.i.l.bf16 %v2713_v34  ;;  %v2720_v61 = vunpack.i.h.bf16 %v2718_v18  ;;  %v2719_v1 = vunpack.i.l.bf16 %v2718_v18 }
 0x7d7   : > { %v2246_v62 = vsel %vm1493_vm2, %v2150_v5, %v2714_v20  ;;  %v2247_v21 = vsel %vm1493_vm2, %v2218_v0, %v2715_v19 }
 0x7d8   : > { %v2723_v23 = vpop.permute.xlu1 %2722  ;;  %v2249_v63 = vsel %vm2248_vm3, %v2246_v62, %v2719_v1  ;;  %v2250_v15 = vsel %vm2248_vm3, %v2247_v21, %v2720_v61 }
 0x7d9   : > { %v2725_v27 = vunpack.i.h.bf16 %v2723_v23  ;;  %v2724_v17 = vunpack.i.l.bf16 %v2723_v23 }
 0x7db   : > { %v2252_v54 = vsel %vm2251_vm4, %v2249_v63, %v2724_v17  ;;  %v2253_v28 = vsel %vm2251_vm4, %v2250_v15, %v2725_v27 }
 0x7dc   : > { %v2254_v29 = vpack.c.bf16 %v2253_v28, %v2252_v54 }
 0x7de   : > { %2614 = vmatmul.mubr.msk.bf16.vlgmr.msra.gmra.mxu0 %vm398_vm0, %v2254_v29 }
 0x89e   : > { %v2323_v32 = vpop.f32.mrf.mxu0 }
 0x89f   : > { %v2324_v33 = vadd.f32 %v2519_v31, %v2323_v32 }
 0x8a0   : > { %v2615_v37 = vpop.f32.mrf.mxu0 }
 0x8a1   : > { %v2330_v38 = vadd.f32 %v2324_v33, %v3205_v26 }
 0x8a2   : > { %v2326_v39 = vpop.f32.mrf.mxu0 }
 0x8a3   : > { %v2533_v41 = vpack.c.bf16 %v2330_v38, %v2330_v38  ;;  %v2327_v43 = vadd.f32 %v2519_v31, %v2326_v39 }
 0x8a4   : > { %v2616_v44 = vpop.f32.mrf.mxu0 }
 0x8a5   : > { %2341 = vst.msk [vmem:[%s392_s19] sm:$0xf] %vm2340_vm5, %v2533_v41  ;;  %v2331_v45 = vadd.f32 %v2327_v43, %v3209_v30 }
 0x8a7   : > { %v2534_v46 = vpack.c.bf16 %v2331_v45, %v2331_v45 }
 0x8a9   : > { %2342 = vst.msk [vmem:[%s392_s19 + $0x4] sm:$0xf] %vm2340_vm5, %v2534_v46 }
 0x8aa   : > { %2901 = shalt.err (!%p2898_p3)
}
 0x8ab   : > { %s2902_s17 = scalar_lea.hbm %s3574_s25, 128  ;;  %s2906_s27 = scalar_lea.hbm %s3630_s9, 256 }
 0x8ac   : > { %p2903_p6 = scmp.ne.s32.totalorder %s3574_s25, %s2902_s17  ;;  %p2907_p0 = scmp.lt.s32.totalorder %s3574_s25, %s3630_s9 }
 0x8ad   : > { %p2908_p11 = scmp.lt.s32.totalorder %s2906_s27, %s2902_s17 }
 0x8ae   : > { %p2904_p4 = pnand %p2903_p6, %p3657_p12 }
 0x8af   : > { %p2909_p5 = por %p2908_p11, %p2907_p0 }
 0x8b0   : > { %p2905_p8 = pneg %p2904_p4 }
 0x8b2   : > { %p2910_p9 = pnand %p2909_p5, %p2905_p8 }
 0x8b4   : > { %2913 = shalt.err (!%p2910_p9)
}
 0x8b5   : > { %s2983_s26 = smov 4  }
 0x8b6   : > { %2631 = dma.vmem_to_hbm [thread:$0]  (%p3657_p12), %s3576_s29, 128, %s3574_s25, %s2344_s7, %s2972_s2, %s2972_s2, %s2983_s26  }
 0x8b7 PF: > { %s2372_s13 = sand.u32 1, %s2948_s30   ;;  %p3658_p7 = scmp.ne.s32.totalorder %s3641_s16, 0 }
 0x8b8   : > { %p3659_p1 = scmp.ge.s32.totalorder %s2960_s12, 2  ;;  %s2373_s24 = scalar_lea.sflag [#allocation4], %s2372_s13 }
 0x8ba   : > { %p2648_p10 = pnand %p3659_p1, %p3658_p7 }
 0x8bc   : > { %p2649_p13 = pneg %p2648_p10 }
 0x8be   : > { %2943 = dma.done.wait (%p2649_p13), %s2373_s24, 128  }
 0x8bf   : > { %2945 = vsyncadd (%p2649_p13), %s2373_s24, 4294967168  ;;  %p24_p2 = scmp.ge.s32.totalorder %s3124_s28, 4   ;;  %s3660_s30 = smov %s2952_s10 }
 0x8c0   : > { %s3661_s10 = smov %s2956_s11  ;;  %s3662_s11 = smov %s3134_s20 }
 0x8c1   : > { %s3663_s12 = smov %s3124_s28  ;;  %26 = sbr.rel (!%p24_p2) target bundleno = 11 (0xb), region = 113 }
 0x8c6   :  { %2378 = vsyncpa [#allocation3], 1 }
 0x8c7   :  { %2380 = vsyncpa [#allocation3 + $0x1], 1 }
 0x8c8   :  { %2381 = vsyncpa [#allocation6], 1 }
 0x8c9   :  { %2382 = vsyncpa [#allocation9], 1 }
 0x8ca   :  { %2383 = vsyncpa [#allocation4], 1 }
 0x8cb   :  { %2385 = vsyncpa [#allocation4 + $0x1], 1 }

</bundles_post_ra>
